<compile_context>
chip_gen: v5e
topology: v5e:2x2
jax: 0.10.0
libtpu: 0.0.40
codegen_flags: <defaults>
</compile_context>

<pallas_src>
import functools
import math

import jax
import jax.numpy as jnp
import numpy as np
from jax.experimental import pallas as pl
from jax.experimental.pallas import tpu as pltpu


# -----------------------------------------------------------------------------
# Positional encoding (identical math to the PyTorch helper), cached per shape.
# -----------------------------------------------------------------------------
def positional_encoding_2d_np(d_model, height, width):
    if d_model % 4 != 0:
        raise ValueError(
            "Cannot use sin/cos positional encoding with odd dimension "
            "(got dim={:d})".format(d_model))
    pe = np.zeros((d_model, height, width), dtype=np.float32)
    dm = d_model // 2
    div_term = np.exp(np.arange(0.0, dm, 2, dtype=np.float32)
                      * -(math.log(10000.0) / dm))
    pos_w = np.arange(0.0, width, dtype=np.float32)[:, None]
    pos_h = np.arange(0.0, height, dtype=np.float32)[:, None]
    pe[0:dm:2, :, :] = np.sin(pos_w * div_term).T[:, None, :].repeat(height, axis=1)
    pe[1:dm:2, :, :] = np.cos(pos_w * div_term).T[:, None, :].repeat(height, axis=1)
    pe[dm::2, :, :] = np.sin(pos_h * div_term).T[:, :, None].repeat(width, axis=2)
    pe[dm + 1::2, :, :] = np.cos(pos_h * div_term).T[:, :, None].repeat(width, axis=2)
    return pe


@functools.lru_cache(maxsize=None)
def positional_encoding_2d_cached(d_model, height, width):
    # Cached host compute; under jit the result becomes a compiled constant.
    return positional_encoding_2d_np(d_model, height, width)


# -----------------------------------------------------------------------------
# Pallas kernel: MHSA for one (batch, query-tile) grid step, channel-major.
# -----------------------------------------------------------------------------
def mhsa_kernel(x_ref, wqkv_ref, bqkv_ref, wo_ref, bo_ref, o_ref, *, heads, tq):
    # Ref shapes (channel-major, sequence axis on lanes):
    #   x_ref    : (C, S)   bf16   x^T full sequence (queries, keys and values)
    #   wqkv_ref : (3C, C)  bf16   fused [Wq; Wk; Wv], (out, in) orientation
    #   bqkv_ref : (3C, 1)  f32    fused biases (lane-broadcast)
    #   wo_ref   : (C, C)   bf16   out-projection weight
    #   bo_ref   : (C, 1)   f32    out-projection bias
    #   o_ref    : (C, TQ)  f32    output tile
    C, S = x_ref.shape
    d_k = C // heads
    scale = 1.0 / math.sqrt(d_k)

    x = x_ref[...]                                            # (C, S) bf16

    # Fused QKV projection over the full sequence: one MXU dot, f32 accumulate.
    qkvT = jnp.dot(wqkv_ref[...], x,
                   preferred_element_type=jnp.float32) + bqkv_ref[...]   # (3C, S)

    kT = qkvT[C:2 * C, :].astype(jnp.bfloat16)                # (C, S)
    vT = qkvT[2 * C:3 * C, :].astype(jnp.bfloat16)            # (C, S)

    if tq == S:
        # Single query tile per batch (main path): Q comes straight from the
        # fused projection, no slicing along lanes.
        qT = qkvT[0:C, :]
    else:
        # Tiled queries: slice the query tile from the same x ref (no second
        # input stream) and project just that tile with the Q rows of W_qkv.
        qi = pl.program_id(1)
        q_start = pl.multiple_of(qi * tq, 128)
        x_q = x_ref[:, pl.ds(q_start, tq)]                    # (C, TQ) bf16
        qT = jnp.dot(wqkv_ref[0:C, :], x_q,
                     preferred_element_type=jnp.float32) + bqkv_ref[0:C, :]

    # Fold 1/sqrt(d_k) into q (cheaper than scaling the (TQ, S) score tensor).
    qT = (qT * scale).astype(jnp.bfloat16)                    # (C, TQ)

    # dimension_numbers instead of explicit transposes:
    #   scores contract the channel (sublane) dim of both operands,
    #   PV contracts the key (lane) dim of both operands.
    dn_scores = (((0,), (0,)), ((), ()))
    dn_pv = (((1,), (1,)), ((), ()))

    # Static per-head loop; per-head outputs stay in registers (no VMEM scratch
    # round trip / masked sublane stores) and are concatenated on sublanes.
    # TODO(synk): for larger d_k, express this as one batched dot_general over
    # a (heads, d_k, ...) reshape to avoid 2-sublane operand slices.
    head_outs = []
    for h in range(heads):
        rows = slice(h * d_k, (h + 1) * d_k)
        # s[q, k] = sum_d qT[d, q] * kT[d, k]  -> (TQ, S), f32
        s = jax.lax.dot_general(qT[rows, :], kT[rows, :], dn_scores,
                                preferred_element_type=jnp.float32)
        # softmax over keys in f32; denominator via EUP approximate reciprocal.
        s = s - jnp.max(s, axis=-1, keepdims=True)
        p = jnp.exp(s)
        p = p * pl.reciprocal(jnp.sum(p, axis=-1, keepdims=True), approx=True)
        # o^T[d, q] = sum_k vT[d, k] * p[q, k]  -> (d_k, TQ), f32
        head_outs.append(jax.lax.dot_general(
            vT[rows, :], p.astype(jnp.bfloat16), dn_pv,
            preferred_element_type=jnp.float32))

    att = head_outs[0] if heads == 1 else jnp.concatenate(head_outs, axis=0)

    # Output projection: out^T = Wo @ att^T + bo, stored lane-dense.
    out = jnp.dot(wo_ref[...], att.astype(jnp.bfloat16),
                  preferred_element_type=jnp.float32) + bo_ref[...]
    o_ref[...] = out.astype(o_ref.dtype)


def _choose_tq(B, S):
    """Pick the query-tile width (static, shape-based)."""
    tq = S
    # Bound the per-head (TQ, S) f32 score tensor (~4 MiB) so larger-S reuse of
    # this kernel stays inside v5e's 16 MiB scoped-VMEM default (v7x has only
    # 64 MiB physical VMEM; set vmem_limit_bytes if you scale this up further).
    while tq > 128 and tq % 256 == 0 and tq * S * 4 > (4 << 20):
        tq //= 2
    # With B == 1 the batch grid axis alone cannot feed both v7x TensorCores;
    # keep >= 2 lane-dense (multiple-of-128) query tiles in that case.
    if B == 1 and tq == S and S % 256 == 0:
        tq = S // 2
    if S % tq != 0:
        tq = S                       # fall back to a single full-width tile
    return tq


def mhsa_attention_pallas(x_cm, params, heads):
    """x_cm: channel-major sequence (B, C, S) -> (B, C, S) attention output."""
    B, C, S = x_cm.shape
    assert C % heads == 0, "d_model must be divisible by heads"
    wq, bq, wk, bk, wv, bv, wo, bo = params

    tq = _choose_tq(B, S)
    nq = S // tq

    # bf16 MXU operands (f32 accumulation + f32 softmax happen in-kernel);
    # this also halves the HBM->VMEM DMA bytes for x and the weights.
    x16 = x_cm.astype(jnp.bfloat16)
    # Fused QKV weight/bias (host-side packing is fused under the outer jit).
    w_qkv = jnp.concatenate([wq, wk, wv], axis=0).astype(jnp.bfloat16)   # (3C, C)
    b_qkv = jnp.concatenate([bq, bk, bv], axis=0).reshape(3 * C, 1)      # (3C, 1)
    b_qkv = b_qkv.astype(jnp.float32)
    wo16 = wo.astype(jnp.bfloat16)
    bo2 = bo.reshape(C, 1).astype(jnp.float32)

    kernel = functools.partial(mhsa_kernel, heads=heads, tq=tq)

    # Constant-index weight/bias blocks.  (When reusing at larger C, consider
    # pipeline_mode=pl.Buffered(1) here to skip pointless double buffering.)
    grid_spec = pltpu.PrefetchScalarGridSpec(
        num_scalar_prefetch=0,
        grid=(B, nq),                      # both axes parallel (megacore / 2 TC)
        in_specs=[
            # Single x^T input: full sequence per batch; block index constant
            # within a batch, so it is only re-DMA'd when the batch changes.
            pl.BlockSpec((pl.Squeezed(), C, S), lambda bi, qi: (bi, 0, 0)),
            pl.BlockSpec((3 * C, C), lambda bi, qi: (0, 0)),   # fused Wqkv
            pl.BlockSpec((3 * C, 1), lambda bi, qi: (0, 0)),   # fused bqkv
            pl.BlockSpec((C, C), lambda bi, qi: (0, 0)),       # Wo
            pl.BlockSpec((C, 1), lambda bi, qi: (0, 0)),       # bo
        ],
        out_specs=pl.BlockSpec((pl.Squeezed(), C, tq), lambda bi, qi: (bi, 0, qi)),
    )

    # TODO(synk): for very long sequences add a KV grid axis with an
    # online-softmax (flash-style) accumulator and set vmem_limit_bytes per
    # generation; unnecessary at these sizes.
    return pl.pallas_call(
        kernel,
        out_shape=jax.ShapeDtypeStruct((B, C, S), jnp.float32),
        grid_spec=grid_spec,
        compiler_params=pltpu.CompilerParams(
            dimension_semantics=("parallel", "parallel")),
    )(x16, w_qkv, b_qkv, wo16, bo2)


# -----------------------------------------------------------------------------
# MHSABlock forward (wrapper / glue), jitted so the PE add is a fused constant.
# -----------------------------------------------------------------------------
@functools.partial(jax.jit, static_argnames=("heads", "pos_enc"))
def mhsa_block_forward(x, params, heads, pos_enc=True):
    """x: (b, c, h, w) NCHW float32 -> (b, c, h, w), same math as MHSABlock."""
    b, c, h, w = x.shape
    x2 = x
    if pos_enc:
        pe = jnp.asarray(positional_encoding_2d_cached(c, h, w))
        x2 = x2 + pe[None, :, :, :]
    # Keep the channel-major (b, c, h*w) layout: the sequence axis is the
    # lane-dense one and the module's permute(0,2,1)s before/after attention
    # cancel out, so no activation transposes are needed at all.
    x_cm = x2.reshape(b, c, h * w)
    att = mhsa_attention_pallas(x_cm, params, heads)          # (b, c, S)
    return att.reshape(b, c, h, w)


# -----------------------------------------------------------------------------
# Pure-JAX reference (PyTorch (B, S, C) layout) for the correctness check
# -----------------------------------------------------------------------------
def mhsa_reference(seq, params, heads):
    wq, bq, wk, bk, wv, bv, wo, bo = params
    B, S, C = seq.shape
    d_k = C // heads
    q = seq @ wq.T + bq
    k = seq @ wk.T + bk
    v = seq @ wv.T + bv
    q = q.reshape(B, S, heads, d_k).transpose(0, 2, 1, 3)
    k = k.reshape(B, S, heads, d_k).transpose(0, 2, 1, 3)
    v = v.reshape(B, S, heads, d_k).transpose(0, 2, 1, 3)
    scores = jnp.einsum("bhqd,bhkd->bhqk", q, k) / math.sqrt(d_k)
    p = jax.nn.softmax(scores, axis=-1)
    o = jnp.einsum("bhqk,bhkd->bhqd", p, v)
    concat = o.transpose(0, 2, 1, 3).reshape(B, S, C)
    return concat @ wo.T + bo


# -----------------------------------------------------------------------------
# Deterministic parameter init (nn.Linear(d_model, d_model)-shaped)
# -----------------------------------------------------------------------------
def init_params(key, d_model):
    ks = jax.random.split(key, 8)
    bound = 1.0 / math.sqrt(d_model)

    def lin(kw, kb):
        W = jax.random.uniform(kw, (d_model, d_model), jnp.float32, -bound, bound)
        b = jax.random.uniform(kb, (d_model,), jnp.float32, -bound, bound)
        return W, b   # (out, in) orientation, like nn.Linear.weight

    wq, bq = lin(ks[0], ks[1])
    wk, bk = lin(ks[2], ks[3])
    wv, bv = lin(ks[4], ks[5])
    wo, bo = lin(ks[6], ks[7])
    return (wq, bq, wk, bk, wv, bv, wo, bo)


if __name__ == "__main__":
    key = jax.random.PRNGKey(0)
    k_x, k_p = jax.random.split(key)

    B, C, H, W = 2, 4, 16, 16     # d_model = C = 4, seq len S = 256
    HEADS = 2                     # d_k = 2

    x = jax.random.normal(k_x, (B, C, H, W), dtype=jnp.float32)
    params = init_params(k_p, C)

    out = mhsa_block_forward(x, params, HEADS, pos_enc=True)
    out = jax.block_until_ready(out)
    assert out.shape == (B, C, H, W)

    # Correctness vs. a pure-f32 reference of the same module math.  Tolerance
    # is loosened because the kernel intentionally uses bf16 MXU operands
    # (f32 accumulation) and an approximate EUP reciprocal in the softmax.
    pe = jnp.asarray(positional_encoding_2d_np(C, H, W))
    seq = (x + pe[None]).reshape(B, C, H * W).transpose(0, 2, 1)
    ref = mhsa_reference(seq, params, HEADS).transpose(0, 2, 1).reshape(B, C, H, W)
    np.testing.assert_allclose(np.asarray(out), np.asarray(ref),
                               rtol=5e-2, atol=5e-2)

    print("KERNEL_OK")
</pallas_src>

<mosaic_0001>
module attributes {stable_mosaic.version = 11 : i64} {
  func.func @mhsa_kernel(%arg0: i32, %arg1: i32, %arg2: memref<1x4x256xbf16, #tpu.memory_space<vmem>>, %arg3: memref<12x4xbf16, #tpu.memory_space<vmem>>, %arg4: memref<12x1xf32, #tpu.memory_space<vmem>>, %arg5: memref<4x4xbf16, #tpu.memory_space<vmem>>, %arg6: memref<4x1xf32, #tpu.memory_space<vmem>>, %arg7: memref<1x4x256xf32, #tpu.memory_space<vmem>>) attributes {dimension_semantics = [#tpu.dimension_semantics<parallel>, #tpu.dimension_semantics<parallel>], iteration_bounds = array<i64: 2, 1>, scalar_prefetch = 0 : i64, scratch_operands = 0 : i64, tpu.core_type = #tpu.core_type<tc>, window_params = [{transform_indices = @transform_0, window_bounds = array<i64: 1, 4, 256>}, {pipeline_mode = #tpu.pipeline_mode<synchronous>, transform_indices = @transform_1, window_bounds = array<i64: 12, 4>}, {pipeline_mode = #tpu.pipeline_mode<synchronous>, transform_indices = @transform_2, window_bounds = array<i64: 12, 1>}, {pipeline_mode = #tpu.pipeline_mode<synchronous>, transform_indices = @transform_3, window_bounds = array<i64: 4, 4>}, {pipeline_mode = #tpu.pipeline_mode<synchronous>, transform_indices = @transform_4, window_bounds = array<i64: 4, 1>}, {transform_indices = @transform_5, window_bounds = array<i64: 1, 4, 256>}]} {
    %c0 = arith.constant 0 : index
    %c0_0 = arith.constant 0 : index
    %c0_1 = arith.constant 0 : index
    %0 = vector.load %arg2[%c0, %c0_0, %c0_1] : memref<1x4x256xbf16, #tpu.memory_space<vmem>>, vector<1x4x256xbf16>
    %1 = vector.shape_cast %0 : vector<1x4x256xbf16> to vector<4x256xbf16>
    %c0_2 = arith.constant 0 : index
    %c0_3 = arith.constant 0 : index
    %2 = vector.load %arg3[%c0_2, %c0_3] : memref<12x4xbf16, #tpu.memory_space<vmem>>, vector<12x4xbf16>
    %cst = arith.constant dense<0.000000e+00> : vector<12x256xf32>
    %3 = tpu.matmul %2, %1, %cst {dimension_numbers = #tpu.dot_dimension_numbers<[1], [0], [0], [1], [0, 0, 1, 1], [], []>} : vector<12x4xbf16>, vector<4x256xbf16>, vector<12x256xf32> -> vector<12x256xf32>
    %c0_4 = arith.constant 0 : index
    %c0_5 = arith.constant 0 : index
    %4 = vector.load %arg4[%c0_4, %c0_5] : memref<12x1xf32, #tpu.memory_space<vmem>>, vector<12x1xf32>
    %5 = vector.broadcast %4 : vector<12x1xf32> to vector<12x256xf32>
    %6 = arith.addf %3, %5 : vector<12x256xf32>
    %7 = vector.extract_strided_slice %6 {offsets = [4, 0], sizes = [4, 256], strides = [1, 1]} : vector<12x256xf32> to vector<4x256xf32>
    %8 = arith.truncf %7 : vector<4x256xf32> to vector<4x256xbf16>
    %9 = vector.extract_strided_slice %6 {offsets = [8, 0], sizes = [4, 256], strides = [1, 1]} : vector<12x256xf32> to vector<4x256xf32>
    %10 = arith.truncf %9 : vector<4x256xf32> to vector<4x256xbf16>
    %11 = vector.extract_strided_slice %6 {offsets = [0, 0], sizes = [4, 256], strides = [1, 1]} : vector<12x256xf32> to vector<4x256xf32>
    %cst_6 = arith.constant 0.707106769 : f32
    %12 = vector.broadcast %cst_6 : f32 to vector<4x256xf32>
    %13 = arith.mulf %11, %12 : vector<4x256xf32>
    %14 = arith.truncf %13 : vector<4x256xf32> to vector<4x256xbf16>
    %15 = vector.extract_strided_slice %14 {offsets = [0, 0], sizes = [2, 256], strides = [1, 1]} : vector<4x256xbf16> to vector<2x256xbf16>
    %16 = vector.extract_strided_slice %8 {offsets = [0, 0], sizes = [2, 256], strides = [1, 1]} : vector<4x256xbf16> to vector<2x256xbf16>
    %cst_7 = arith.constant dense<0.000000e+00> : vector<256x256xf32>
    %17 = tpu.matmul %15, %16, %cst_7 {dimension_numbers = #tpu.dot_dimension_numbers<[0], [0], [1], [1], [0, 1, 1, 1], [], []>} : vector<2x256xbf16>, vector<2x256xbf16>, vector<256x256xf32> -> vector<256x256xf32>
    %cst_8 = arith.constant dense<0xFF800000> : vector<256xf32>
    %18 = vector.multi_reduction <maximumf>, %17, %cst_8 [1] : vector<256x256xf32> to vector<256xf32>
    %19 = vector.shape_cast %18 : vector<256xf32> to vector<256x1xf32>
    %20 = vector.broadcast %19 : vector<256x1xf32> to vector<256x256xf32>
    %21 = arith.subf %17, %20 : vector<256x256xf32>
    %22 = math.exp %21 : vector<256x256xf32>
    %cst_9 = arith.constant dense<0.000000e+00> : vector<256xf32>
    %23 = vector.multi_reduction <add>, %22, %cst_9 [1] : vector<256x256xf32> to vector<256xf32>
    %24 = vector.shape_cast %23 : vector<256xf32> to vector<256x1xf32>
    %25 = tpu.reciprocal %24 {approx = true} : vector<256x1xf32> -> vector<256x1xf32>
    %26 = vector.broadcast %25 : vector<256x1xf32> to vector<256x256xf32>
    %27 = arith.mulf %22, %26 : vector<256x256xf32>
    %28 = vector.extract_strided_slice %10 {offsets = [0, 0], sizes = [2, 256], strides = [1, 1]} : vector<4x256xbf16> to vector<2x256xbf16>
    %29 = arith.truncf %27 : vector<256x256xf32> to vector<256x256xbf16>
    %cst_10 = arith.constant dense<0.000000e+00> : vector<2x256xf32>
    %30 = tpu.matmul %28, %29, %cst_10 {dimension_numbers = #tpu.dot_dimension_numbers<[1], [1], [0], [0], [0, 0, 1, 0], [], []>} : vector<2x256xbf16>, vector<256x256xbf16>, vector<2x256xf32> -> vector<2x256xf32>
    %31 = vector.extract_strided_slice %14 {offsets = [2, 0], sizes = [2, 256], strides = [1, 1]} : vector<4x256xbf16> to vector<2x256xbf16>
    %32 = vector.extract_strided_slice %8 {offsets = [2, 0], sizes = [2, 256], strides = [1, 1]} : vector<4x256xbf16> to vector<2x256xbf16>
    %cst_11 = arith.constant dense<0.000000e+00> : vector<256x256xf32>
    %33 = tpu.matmul %31, %32, %cst_11 {dimension_numbers = #tpu.dot_dimension_numbers<[0], [0], [1], [1], [0, 1, 1, 1], [], []>} : vector<2x256xbf16>, vector<2x256xbf16>, vector<256x256xf32> -> vector<256x256xf32>
    %cst_12 = arith.constant dense<0xFF800000> : vector<256xf32>
    %34 = vector.multi_reduction <maximumf>, %33, %cst_12 [1] : vector<256x256xf32> to vector<256xf32>
    %35 = vector.shape_cast %34 : vector<256xf32> to vector<256x1xf32>
    %36 = vector.broadcast %35 : vector<256x1xf32> to vector<256x256xf32>
    %37 = arith.subf %33, %36 : vector<256x256xf32>
    %38 = math.exp %37 : vector<256x256xf32>
    %cst_13 = arith.constant dense<0.000000e+00> : vector<256xf32>
    %39 = vector.multi_reduction <add>, %38, %cst_13 [1] : vector<256x256xf32> to vector<256xf32>
    %40 = vector.shape_cast %39 : vector<256xf32> to vector<256x1xf32>
    %41 = tpu.reciprocal %40 {approx = true} : vector<256x1xf32> -> vector<256x1xf32>
    %42 = vector.broadcast %41 : vector<256x1xf32> to vector<256x256xf32>
    %43 = arith.mulf %38, %42 : vector<256x256xf32>
    %44 = vector.extract_strided_slice %10 {offsets = [2, 0], sizes = [2, 256], strides = [1, 1]} : vector<4x256xbf16> to vector<2x256xbf16>
    %45 = arith.truncf %43 : vector<256x256xf32> to vector<256x256xbf16>
    %cst_14 = arith.constant dense<0.000000e+00> : vector<2x256xf32>
    %46 = tpu.matmul %44, %45, %cst_14 {dimension_numbers = #tpu.dot_dimension_numbers<[1], [1], [0], [0], [0, 0, 1, 0], [], []>} : vector<2x256xbf16>, vector<256x256xbf16>, vector<2x256xf32> -> vector<2x256xf32>
    %47 = tpu.concatenate %30, %46 in 0 : vector<2x256xf32>, vector<2x256xf32> -> vector<4x256xf32>
    %c0_15 = arith.constant 0 : index
    %c0_16 = arith.constant 0 : index
    %48 = vector.load %arg5[%c0_15, %c0_16] : memref<4x4xbf16, #tpu.memory_space<vmem>>, vector<4x4xbf16>
    %49 = arith.truncf %47 : vector<4x256xf32> to vector<4x256xbf16>
    %cst_17 = arith.constant dense<0.000000e+00> : vector<4x256xf32>
    %50 = tpu.matmul %48, %49, %cst_17 {dimension_numbers = #tpu.dot_dimension_numbers<[1], [0], [0], [1], [0, 0, 1, 1], [], []>} : vector<4x4xbf16>, vector<4x256xbf16>, vector<4x256xf32> -> vector<4x256xf32>
    %c0_18 = arith.constant 0 : index
    %c0_19 = arith.constant 0 : index
    %51 = vector.load %arg6[%c0_18, %c0_19] : memref<4x1xf32, #tpu.memory_space<vmem>>, vector<4x1xf32>
    %52 = vector.broadcast %51 : vector<4x1xf32> to vector<4x256xf32>
    %53 = arith.addf %50, %52 : vector<4x256xf32>
    %c0_20 = arith.constant 0 : index
    %c0_21 = arith.constant 0 : index
    %c0_22 = arith.constant 0 : index
    %54 = vector.load %arg7[%c0_20, %c0_21, %c0_22] : memref<1x4x256xf32, #tpu.memory_space<vmem>>, vector<1x4x256xf32>
    %55 = vector.shape_cast %54 : vector<1x4x256xf32> to vector<4x256xf32>
    %56 = vector.shape_cast %53 : vector<4x256xf32> to vector<1x4x256xf32>
    tpu.vector_store %arg7[%c0_20, %c0_21, %c0_22], %56 {strides = array<i32>} : memref<1x4x256xf32, #tpu.memory_space<vmem>>, vector<1x4x256xf32>,
    return
  }
  func.func @transform_0(%arg0: i32, %arg1: i32) -> (i32, i32, i32) {
    %c0_i32 = arith.constant 0 : i32
    %c0_i32_0 = arith.constant 0 : i32
    %c0_i32_1 = arith.constant 0 : i32
    return %arg0, %c0_i32, %c0_i32_0 : i32, i32, i32
  }
  func.func @transform_1(%arg0: i32, %arg1: i32) -> (i32, i32) {
    %c0_i32 = arith.constant 0 : i32
    %c0_i32_0 = arith.constant 0 : i32
    %c0_i32_1 = arith.constant 0 : i32
    return %c0_i32, %c0_i32_0 : i32, i32
  }
  func.func @transform_2(%arg0: i32, %arg1: i32) -> (i32, i32) {
    %c0_i32 = arith.constant 0 : i32
    %c0_i32_0 = arith.constant 0 : i32
    %c0_i32_1 = arith.constant 0 : i32
    return %c0_i32, %c0_i32_0 : i32, i32
  }
  func.func @transform_3(%arg0: i32, %arg1: i32) -> (i32, i32) {
    %c0_i32 = arith.constant 0 : i32
    %c0_i32_0 = arith.constant 0 : i32
    %c0_i32_1 = arith.constant 0 : i32
    return %c0_i32, %c0_i32_0 : i32, i32
  }
  func.func @transform_4(%arg0: i32, %arg1: i32) -> (i32, i32) {
    %c0_i32 = arith.constant 0 : i32
    %c0_i32_0 = arith.constant 0 : i32
    %c0_i32_1 = arith.constant 0 : i32
    return %c0_i32, %c0_i32_0 : i32, i32
  }
  func.func @transform_5(%arg0: i32, %arg1: i32) -> (i32, i32, i32) {
    %c0_i32 = arith.constant 0 : i32
    %c0_i32_0 = arith.constant 0 : i32
    return %arg0, %c0_i32, %arg1 : i32, i32, i32
  }
}

</mosaic_0001>

<bundles_post_ra>
// kernel: mhsa_block_forward.1
= control target key start
LH: loop header
LB: loop body
LE: loop exit
PB: predicated region body
PF: predicated region fallthrough
CT: control target
= control target key end

     0   :  { %s2681_s18 = smov 0   ;;  %s2683_s19 = smov 0   ;;  %s4140_s0 = inlined_call_operand.vmem [shape: bf16[2,4,256], index: 0, kind: input, shape index: {}]   ;;  %s4141_s1 = inlined_call_operand.vmem [shape: bf16[12,4], index: 1, kind: input, shape index: {}]   ;;  %s4142_s2 = inlined_call_operand.vmem [shape: f32[12,1], index: 2, kind: input, shape index: {}]   ;;  %s4143_s3 = inlined_call_operand.vmem [shape: bf16[4,4], index: 3, kind: input, shape index: {}]   ;;  %s4144_s4 = inlined_call_operand.vmem [shape: f32[4,1], index: 4, kind: input, shape index: {}]   ;;  %s4145_s5 = inlined_call_operand.vmem [shape: f32[2,4,256], index: 5, kind: output, shape index: {}]  }
   0x1   :  { %s2685_s20 = smov 0  }
   0x2 LB: > { %s27_s21 = sadd.s32 1, %s2644_s19  ;;  %p2132_p0 = scmp.ge.s32.totalorder %s2648_s20, 1  ;;  %s2648_s20 = sphi %s2685_s20, %s15_s20   ;;  %s2644_s19 = sphi %s2683_s19, %s4368_s19   ;;  %s2640_s18 = sphi %s2681_s18, %s4367_s18  }
   0x3   : > { %p29_p1 = scmp.ge.s32.totalorder %s27_s21, 2  ;;  %p201_p2 = scmp.lt.s32.totalorder %s2648_s20, 3 }
   0x5   : > { %s4370_s21 = smov (%p29_p1, %s27_s21), 0  ;;  %p202_p3 = pnand %p2132_p0, %p201_p2 }
   0x7   : > { %205 = sbr.rel (%p202_p3) target bundleno = 2245 (0x8c5), region = 40 }
   0xc   : > { %p233_p4 = scmp.lt.s32.totalorder %s2640_s18, 1  ;;  %v252_v0 = vld [vmem:[%s4142_s2] sm:$0xff]  ;;  %v4146_v1 = vmov 0   ;;  %vm277_vm0 = vcmask 1041408   ;;  %vm273_vm1 = vcmask 31744   ;;  %vm402_vm2 = vcmask 1040384  }
   0xd   : > { %2239 = vset.pattern.permute.xlu0 %v4146_v1  ;;  %2240 = vset.pattern.permute.xlu2 %v4146_v1  ;;  %v2139_v3 = vld [vmem:[%s4141_s1] sm:$0xf]  ;;  %v2213_v4 = vld [vmem:[%s4141_s1] sm:$0x30]  ;;  %vm353_vm3 = vcmask 15360   ;;  %vm2043_vm4 = vcmask 1043456  }
   0xe   : > { %s4372_s18 = smov (!%p233_p4, %s2640_s18), 1  ;;  %256 = vperm.xlu0 %2239, %v252_v0   ;;  %v2140_v9 = vor.u32 %v2213_v4, %v2139_v3 }
   0xf   : > { %s2211_s24 = sshll.u32 %s4372_s18, 2  ;;  %s2212_s13 = sshll.u32 %s4372_s18, 3 }
  0x10   : > { %s237_s27 = scalar_lea.vmem %s4140_s0, %s2211_s24  ;;  %s246_s16 = scalar_lea.vmem %s4145_s5, %s2212_s13 }
  0x11   : > { %v249_v2 = vld [vmem:[%s237_s27] sm:$0xf] }
  0x12   : > { %270 = vst [vmem:[#allocation1] ss:$4 sm:$0xff] %v249_v2 }
  0x19   : > { %v271_v5 = vld.sshfl [vmem:[#allocation1] sm:$0xff pattern:$0x73625140]  ;;  %v272_v6 = vld.sshfl [vmem:[#allocation1 + $0x8] sm:$0xff pattern:$0x73625140] }
  0x1a   : > { %v278_v7 = vsel %vm277_vm0, %v271_v5, 0  ;;  %v280_v8 = vsel %vm277_vm0, %v272_v6, 0 }
  0x1b   : > { %289 = vmatpush.bf16.msra.mxu2 %v278_v7  ;;  %303 = vmatpush.bf16.msra.mxu3 %v280_v8 }
  0x1e   : > { %2141 = vmatmul.msk.bf16.vlgmr.msra.gmra.mxu2 %vm273_vm1, %v2140_v9  ;;  %2142 = vmatmul.msk.bf16.vlgmr.msra.gmra.mxu3 %vm273_vm1, %v2140_v9 }
  0x80   : > { %v257_v10 = vpop.permute.xlu0 %256 }
  0xa1   : > { %v291_v11 = vpop.f32.mrf.mxu2  ;;  %v305_v12 = vpop.f32.mrf.mxu3 }
  0xa2   : > { %v292_v13 = vadd.f32 %v291_v11, %v257_v10  ;;  %v306_v14 = vadd.f32 %v305_v12, %v257_v10 }
  0xa4   : > { %v312_v15 = vmul.f32 0.70710677, %v292_v13  ;;  %v310_v16 = vpack.c.bf16 %v306_v14, %v292_v13  ;;  %v313_v17 = vmul.f32 0.70710677, %v306_v14 }
  0xa6   : > { %v314_v18 = vpack.c.bf16 %v313_v17, %v312_v15  ;;  %v347_v19 = vunpack.c.l.b16 %v310_v16  ;;  %v348_v20 = vunpack.c.h.b16 %v310_v16 }
  0xa8   : > { %v316_v21 = vunpack.c.l.b16 %v314_v18  ;;  %v317_v22 = vunpack.c.h.b16 %v314_v18  ;;  %v349_v23 = vpack.c.b16 %v347_v19, %v347_v19  ;;  %v350_v24 = vpack.c.b16 %v348_v20, %v348_v20 }
  0xa9   : > { %v2748_v50 = vpop.f32.mrf.mxu2  ;;  %v2750_v51 = vpop.f32.mrf.mxu3 }
  0xaa   : > { %v2720_v25 = vpack.c.b16 %v316_v21, %v316_v21  ;;  %v2722_v26 = vpack.c.b16 %v317_v22, %v317_v22  ;;  %v351_v27 = vrot.slane %v349_v23, 2  ;;  %v352_v28 = vrot.slane %v350_v24, 2  ;;  %4218 = vst [vmem:[#allocation6_spill] sm:$0xff] %v2748_v50 }
  0xab   : > { %v1186_v29 = vrot.slane %v349_v23, 3  ;;  %v1187_v30 = vrot.slane %v350_v24, 3  ;;  %4219 = vst [vmem:[#allocation7_spill] sm:$0xff] %v2750_v51 }
  0xac   : > { %4214 = vst [vmem:[#allocation2_spill] sm:$0xff] %v2720_v25  ;;  %322 = vxpose.binary.xlu0.c.b16.start.end [1/2] (short) %v2722_v26, %v2720_v25, 128  ;;  %v404_v31 = vsel %vm402_vm2, %v351_v27, 0  ;;  %v407_v32 = vsel %vm402_vm2, %v352_v28, 0 }
  0xad   : > { %4215 = vst [vmem:[#allocation3_spill] sm:$0xff] %v2722_v26  ;;  %416 = vmatpush.bf16.msrb.mxu2 %v404_v31  ;;  %505 = vmatpush.bf16.msrb.mxu3 %v407_v32  ;;  %v2726_v33 = vsel %vm402_vm2, %v1186_v29, 0  ;;  %v2728_v34 = vsel %vm402_vm2, %v1187_v30, 0 }
  0xae   : > { %4216 = vst [vmem:[#allocation4_spill] sm:$0xff] %v2726_v33 }
  0xaf   : > { %4217 = vst [vmem:[#allocation5_spill] sm:$0xff] %v2728_v34 }
 0x158   : > { %v330_v35 = vpop.trf.xlu0 }
 0x159   : > { %2143 = vmatmul.msk.bf16.vlgmr.msrb.gmra.mxu2 %vm353_vm3, %v330_v35  ;;  %2159 = vmatmul.msk.bf16.vlgmr.msrb.gmra.mxu3 %vm353_vm3, %v330_v35 }
 0x160   : > { %v331_v36 = vpop.trf.xlu0 }
 0x168   : > { %v332_v37 = vpop.trf.xlu0 }
 0x169   : > { %2144 = vmatmul.msk.bf16.gmra.mxu2 %vm353_vm3, %v332_v37  ;;  %2160 = vmatmul.msk.bf16.gmra.mxu3 %vm353_vm3, %v332_v37 }
 0x170   : > { %v333_v38 = vpop.trf.xlu0 }
 0x178   : > { %v334_v39 = vpop.trf.xlu0 }
 0x179   : > { %2145 = vmatmul.msk.bf16.gmra.mxu2 %vm353_vm3, %v334_v39  ;;  %2161 = vmatmul.msk.bf16.gmra.mxu3 %vm353_vm3, %v334_v39 }
 0x180   : > { %v335_v40 = vpop.trf.xlu0 }
 0x188   : > { %v336_v41 = vpop.trf.xlu0 }
 0x189   : > { %2146 = vmatmul.msk.bf16.gmra.mxu2 %vm353_vm3, %v336_v41  ;;  %2162 = vmatmul.msk.bf16.gmra.mxu3 %vm353_vm3, %v336_v41 }
 0x190   : > { %v337_v42 = vpop.trf.xlu0 }
 0x198   : > { %v338_v43 = vpop.trf.xlu0 }
 0x199   : > { %2147 = vmatmul.msk.bf16.gmra.mxu2 %vm353_vm3, %v338_v43  ;;  %2163 = vmatmul.msk.bf16.gmra.mxu3 %vm353_vm3, %v338_v43 }
 0x1a0   : > { %v339_v44 = vpop.trf.xlu0 }
 0x1a8   : > { %v340_v45 = vpop.trf.xlu0 }
 0x1a9   : > { %2148 = vmatmul.msk.bf16.gmra.mxu2 %vm353_vm3, %v340_v45  ;;  %2164 = vmatmul.msk.bf16.gmra.mxu3 %vm353_vm3, %v340_v45 }
 0x1b0   : > { %v341_v46 = vpop.trf.xlu0 }
 0x1b8   : > { %v342_v47 = vpop.trf.xlu0 }
 0x1b9   : > { %2149 = vmatmul.msk.bf16.gmra.mxu2 %vm353_vm3, %v342_v47  ;;  %2165 = vmatmul.msk.bf16.gmra.mxu3 %vm353_vm3, %v342_v47 }
 0x1c0   : > { %v2744_v48 = vpop.trf.xlu0 }
 0x1c8   : > { %v344_v49 = vpop.trf.xlu0 }
 0x1c9   : > { %2150 = vmatmul.msk.bf16.gmra.mxu2 %vm353_vm3, %v344_v49  ;;  %2166 = vmatmul.msk.bf16.gmra.mxu3 %vm353_vm3, %v344_v49 }
 0x1d0   : > { %v345_v35 = vpop.trf.xlu0 }
 0x1d9   : > { %2151 = vmatmul.msk.bf16.gmra.mxu2 %vm353_vm3, %v331_v36  ;;  %2167 = vmatmul.msk.bf16.gmra.mxu3 %vm353_vm3, %v331_v36 }
 0x1dc   : > { %v2754_v52 = vpop.f32.mrf.mxu2  ;;  %v2756_v53 = vpop.f32.mrf.mxu3 }
 0x1dd   : > { %v587_v6 = vmax.f32 %v2754_v52, %v2756_v53 }
 0x1e4   : > { %v2758_v54 = vpop.f32.mrf.mxu2  ;;  %v2760_v55 = vpop.f32.mrf.mxu3 }
 0x1e5   : > { %v590_v11 = vmax.f32 %v2758_v54, %v2760_v55 }
 0x1e9   : > { %2152 = vmatmul.msk.bf16.gmra.mxu2 %vm353_vm3, %v333_v38  ;;  %2168 = vmatmul.msk.bf16.gmra.mxu3 %vm353_vm3, %v333_v38 }
 0x1ec   : > { %v2764_v56 = vpop.f32.mrf.mxu2  ;;  %v2766_v57 = vpop.f32.mrf.mxu3 }
 0x1ed   : > { %v593_v2 = vmax.f32 %v2764_v56, %v2766_v57 }
 0x1f4   : > { %v2768_v58 = vpop.f32.mrf.mxu2  ;;  %v2770_v59 = vpop.f32.mrf.mxu3 }
 0x1f5   : > { %v596_v7 = vmax.f32 %v2768_v58, %v2770_v59 }
 0x1f9   : > { %2153 = vmatmul.msk.bf16.gmra.mxu2 %vm353_vm3, %v335_v40  ;;  %2169 = vmatmul.msk.bf16.gmra.mxu3 %vm353_vm3, %v335_v40 }
 0x1fc   : > { %v2774_v60 = vpop.f32.mrf.mxu2  ;;  %v2776_v61 = vpop.f32.mrf.mxu3 }
 0x1fd   : > { %v599_v62 = vmax.f32 %v2774_v60, %v2776_v61 }
 0x1ff   : > { %600 = vmax.xlane.f32.xlu2 %v599_v62 }
 0x204   : > { %v2780_v63 = vpop.f32.mrf.mxu2  ;;  %v2782_v0 = vpop.f32.mrf.mxu3 }
 0x205   : > { %v602_v3 = vmax.f32 %v2780_v63, %v2782_v0 }
 0x207   : > { %594 = vmax.xlane.f32.xlu2 %v593_v2  ;;  %603 = vmax.xlane.f32.xlu1 %v602_v3 }
 0x209   : > { %2154 = vmatmul.msk.bf16.gmra.mxu2 %vm353_vm3, %v337_v42  ;;  %2170 = vmatmul.msk.bf16.gmra.mxu3 %vm353_vm3, %v337_v42 }
 0x20c   : > { %v2790_v4 = vpop.f32.mrf.mxu2  ;;  %v2792_v5 = vpop.f32.mrf.mxu3 }
 0x20d   : > { %v605_v8 = vmax.f32 %v2790_v4, %v2792_v5 }
 0x20f   : > { %588 = vmax.xlane.f32.xlu2 %v587_v6  ;;  %597 = vmax.xlane.f32.xlu1 %v596_v7 }
 0x210   : > { %606 = vmax.xlane.f32.xlu0 %v605_v8 }
 0x214   : > { %v2800_v9 = vpop.f32.mrf.mxu2  ;;  %v2802_v10 = vpop.f32.mrf.mxu3 }
 0x215   : > { %v608_v14 = vmax.f32 %v2800_v9, %v2802_v10 }
 0x217   : > { %591 = vmax.xlane.f32.xlu1 %v590_v11 }
 0x219   : > { %2155 = vmatmul.msk.bf16.gmra.mxu2 %vm353_vm3, %v339_v44  ;;  %2171 = vmatmul.msk.bf16.gmra.mxu3 %vm353_vm3, %v339_v44 }
 0x21c   : > { %v2808_v12 = vpop.f32.mrf.mxu2  ;;  %v2810_v13 = vpop.f32.mrf.mxu3 }
 0x21d   : > { %v611_v17 = vmax.f32 %v2808_v12, %v2810_v13 }
 0x21f   : > { %609 = vmax.xlane.f32.xlu1 %v608_v14 }
 0x224   : > { %v2814_v15 = vpop.f32.mrf.mxu2  ;;  %v2816_v16 = vpop.f32.mrf.mxu3 }
 0x225   : > { %v614_v18 = vmax.f32 %v2814_v15, %v2816_v16 }
 0x227   : > { %612 = vmax.xlane.f32.xlu1 %v611_v17  ;;  %615 = vmax.xlane.f32.xlu2 %v614_v18 }
 0x229   : > { %2156 = vmatmul.msk.bf16.gmra.mxu2 %vm353_vm3, %v341_v46  ;;  %2172 = vmatmul.msk.bf16.gmra.mxu3 %vm353_vm3, %v341_v46 }
 0x22c   : > { %v2824_v19 = vpop.f32.mrf.mxu2  ;;  %v2826_v20 = vpop.f32.mrf.mxu3 }
 0x22d   : > { %v617_v21 = vmax.f32 %v2824_v19, %v2826_v20 }
 0x22f   : > { %618 = vmax.xlane.f32.xlu1 %v617_v21 }
 0x234   : > { %v2830_v22 = vpop.f32.mrf.mxu2  ;;  %v2832_v23 = vpop.f32.mrf.mxu3 }
 0x235   : > { %v620_v24 = vmax.f32 %v2830_v22, %v2832_v23 }
 0x237   : > { %621 = vmax.xlane.f32.xlu2 %v620_v24 }
 0x239   : > { %2157 = vmatmul.msk.bf16.gmra.mxu2 %vm353_vm3, %v2744_v48  ;;  %2173 = vmatmul.msk.bf16.gmra.mxu3 %vm353_vm3, %v2744_v48 }
 0x23c   : > { %v2840_v27 = vpop.f32.mrf.mxu2  ;;  %v2842_v28 = vpop.f32.mrf.mxu3 }
 0x23d   : > { %v623_v29 = vmax.f32 %v2840_v27, %v2842_v28 }
 0x23f   : > { %624 = vmax.xlane.f32.xlu2 %v623_v29 }
 0x244   : > { %v2846_v30 = vpop.f32.mrf.mxu2  ;;  %v2848_v31 = vpop.f32.mrf.mxu3 }
 0x245   : > { %v626_v32 = vmax.f32 %v2846_v30, %v2848_v31 }
 0x247   : > { %627 = vmax.xlane.f32.xlu2 %v626_v32 }
 0x249   : > { %2158 = vmatmul.msk.bf16.gmra.mxu2 %vm353_vm3, %v345_v35  ;;  %2174 = vmatmul.msk.bf16.gmra.mxu3 %vm353_vm3, %v345_v35 }
 0x24c   : > { %v2854_v36 = vpop.f32.mrf.mxu2  ;;  %v2856_v37 = vpop.f32.mrf.mxu3 }
 0x24d   : > { %v629_v38 = vmax.f32 %v2854_v36, %v2856_v37 }
 0x24f   : > { %630 = vmax.xlane.f32.xlu1 %v629_v38 }
 0x254   : > { %v2860_v39 = vpop.f32.mrf.mxu2  ;;  %v2862_v40 = vpop.f32.mrf.mxu3 }
 0x255   : > { %v632_v41 = vmax.f32 %v2860_v39, %v2862_v40 }
 0x257   : > { %633 = vmax.xlane.f32.xlu1 %v632_v41 }
 0x25c   : > { %v2866_v42 = vpop.f32.mrf.mxu2  ;;  %v2868_v43 = vpop.f32.mrf.mxu3 }
 0x25d   : > { %4220 = vst [vmem:[#allocation8_spill] sm:$0xff] %v2866_v42  ;;  %v635_v44 = vmax.f32 %v2866_v42, %v2868_v43 }
 0x25e   : > { %4221 = vst [vmem:[#allocation9_spill] sm:$0xff] %v2868_v43 }
 0x25f   : > { %636 = vmax.xlane.f32.xlu2 %v635_v44 }
 0x264   : > { %v2872_v45 = vpop.f32.mrf.mxu2  ;;  %v2874_v46 = vpop.f32.mrf.mxu3 }
 0x265   : > { %4222 = vst [vmem:[#allocation10_spill] sm:$0xff] %v2872_v45  ;;  %v638_v47 = vmax.f32 %v2872_v45, %v2874_v46 }
 0x266   : > { %4223 = vst [vmem:[#allocation11_spill] sm:$0xff] %v2874_v46 }
 0x267   : > { %639 = vmax.xlane.f32.xlu1 %v638_v47 }
 0x26c   : > { %v2878_v48 = vpop.f32.mrf.mxu2  ;;  %v2880_v49 = vpop.f32.mrf.mxu3 }
 0x26d   : > { %v641_v62 = vmax.f32 %v2878_v48, %v2880_v49 }
 0x26f   : > { %642 = vmax.xlane.f32.xlu2 %v641_v62 }
 0x272   : > { %v601_v2 = vpop.xlane.xlu2 %600 }
 0x273   : > { %v691_v3 = vsub.f32 %v2774_v60, %v601_v2  ;;  %v692_v6 = vsub.f32 %v2776_v61, %v601_v2 }
 0x274   : > { %v2886_v7 = vpop.f32.mrf.mxu2  ;;  %v2888_v8 = vpop.f32.mrf.mxu3 }
 0x275   : > { %4224 = vst [vmem:[#allocation12_spill] sm:$0xff] %v2886_v7  ;;  %v644_v11 = vmax.f32 %v2886_v7, %v2888_v8  ;;  %v763_v14 = vmul.f32 1.442695, %v691_v3  ;;  %v765_v17 = vmul.f32 1.442695, %v692_v6 }
 0x276   : > { %4225 = vst [vmem:[#allocation13_spill] sm:$0xff] %v2888_v8 }
 0x277   : > { %645 = vmax.xlane.f32.xlu1 %v644_v11  ;;  %2242 = vpow2.f32 %v763_v14 }
 0x278   : > { %2244 = vpow2.f32 %v765_v17 }
 0x27a   : > { %v2892_v18 = vpop.xlane.xlu1 %603  ;;  %v2916_v6 = vpop.xlane.xlu2 %594 }
 0x27c   : > { %v2894_v21 = vpop.f32.mrf.mxu2  ;;  %v2896_v24 = vpop.f32.mrf.mxu3 }
 0x27d   : > { %v647_v60 = vmax.f32 %v2894_v21, %v2896_v24  ;;  %v2900_v61 = vpop.eup %2242 }
 0x27e   : > { %4226 = vst [vmem:[#allocation14_spill] sm:$0xff] %v2900_v61  ;;  %v2902_v29 = vpop.eup %2244 }
 0x27f   : > { %648 = vmax.xlane.f32.xlu2 %v647_v60  ;;  %4227 = vst [vmem:[#allocation15_spill] sm:$0xff] %v2902_v29  ;;  %v887_v62 = vadd.f32 %v2902_v29, %v2900_v61 }
 0x282   : > { %v2904_v32 = vpop.xlane.xlu1 %597 }
 0x283   : > { %v607_v35 = vpop.xlane.xlu0 %606 }
 0x284   : > { %v695_v38 = vsub.f32 %v2790_v4, %v607_v35  ;;  %v696_v41 = vsub.f32 %v2792_v5, %v607_v35  ;;  %v2908_v44 = vpop.f32.mrf.mxu2  ;;  %v2910_v47 = vpop.f32.mrf.mxu3 }
 0x285   : > { %4228 = vst [vmem:[#allocation16_spill] sm:$0xff] %v2908_v44  ;;  %v650_v2 = vmax.f32 %v2908_v44, %v2910_v47 }
 0x286   : > { %4229 = vst [vmem:[#allocation17_spill] sm:$0xff] %v2910_v47  ;;  %v771_v3 = vmul.f32 1.442695, %v695_v38  ;;  %v773_v11 = vmul.f32 1.442695, %v696_v41  ;;  %v2930_v38 = vpop.xlane.xlu2 %588 }
 0x287   : > { %888 = vadd.xlane.f32.xlu2 %v887_v62  ;;  %651 = vmax.xlane.f32.xlu1 %v650_v2 }
 0x288   : > { %2246 = vpow2.f32 %v771_v3 }
 0x289   : > { %2248 = vpow2.f32 %v773_v11 }
 0x28a   : > { %v2918_v14 = vpop.xlane.xlu1 %591 }
 0x28c   : > { %v2920_v4 = vpop.f32.mrf.mxu2  ;;  %v2922_v5 = vpop.f32.mrf.mxu3 }
 0x28d   : > { %v653_v17 = vmax.f32 %v2920_v4, %v2922_v5 }
 0x28e   : > { %v2926_v60 = vpop.eup %2246 }
 0x28f   : > { %654 = vmax.xlane.f32.xlu2 %v653_v17  ;;  %v2928_v35 = vpop.eup %2248 }
 0x290   : > { %v893_v17 = vadd.f32 %v2928_v35, %v2926_v60 }
 0x292   : > { %v610_v62 = vpop.xlane.xlu1 %609 }
 0x293   : > { %v697_v41 = vsub.f32 %v2800_v9, %v610_v62  ;;  %v698_v2 = vsub.f32 %v2802_v10, %v610_v62 }
 0x294   : > { %v2934_v3 = vpop.f32.mrf.mxu2  ;;  %v2936_v11 = vpop.f32.mrf.mxu3 }
 0x295   : > { %v775_v1 = vmul.f32 1.442695, %v697_v41  ;;  %v777_v34 = vmul.f32 1.442695, %v698_v2  ;;  %v656_v33 = vmax.f32 %v2934_v3, %v2936_v11 }
 0x297   : > { %2250 = vpow2.f32 %v775_v1  ;;  %894 = vadd.xlane.f32.xlu2 %v893_v17  ;;  %657 = vmax.xlane.f32.xlu1 %v656_v33 }
 0x298   : > { %2252 = vpow2.f32 %v777_v34 }
 0x29a   : > { %v613_v51 = vpop.xlane.xlu1 %612  ;;  %v616_v9 = vpop.xlane.xlu2 %615 }
 0x29b   : > { %v699_v10 = vsub.f32 %v2808_v12, %v613_v51  ;;  %v700_v62 = vsub.f32 %v2810_v13, %v613_v51  ;;  %v701_v29 = vsub.f32 %v2814_v15, %v616_v9  ;;  %v702_v34 = vsub.f32 %v2816_v16, %v616_v9 }
 0x29c   : > { %v2944_v50 = vpop.f32.mrf.mxu2  ;;  %v2946_v41 = vpop.f32.mrf.mxu3 }
 0x29d   : > { %v2948_v2 = vpop.eup %2250  ;;  %v779_v26 = vmul.f32 1.442695, %v699_v10  ;;  %v781_v25 = vmul.f32 1.442695, %v700_v62  ;;  %v659_v1 = vmax.f32 %v2944_v50, %v2946_v41  ;;  %v783_v12 = vmul.f32 1.442695, %v701_v29 }
 0x29e   : > { %v2953_v33 = vpop.eup %2252  ;;  %v785_v13 = vmul.f32 1.442695, %v702_v34 }
 0x29f   : > { %2254 = vpow2.f32 %v779_v26  ;;  %660 = vmax.xlane.f32.xlu2 %v659_v1  ;;  %v896_v51 = vadd.f32 %v2953_v33, %v2948_v2 }
 0x2a0   : > { %2256 = vpow2.f32 %v781_v25 }
 0x2a1   : > { %897 = vadd.xlane.f32.xlu1 %v896_v51  ;;  %2258 = vpow2.f32 %v783_v12 }
 0x2a2   : > { %v619_v17 = vpop.xlane.xlu1 %618  ;;  %2260 = vpow2.f32 %v785_v13 }
 0x2a3   : > { %v703_v61 = vsub.f32 %v2824_v19, %v619_v17  ;;  %v704_v25 = vsub.f32 %v2826_v20, %v619_v17 }
 0x2a4   : > { %v2958_v10 = vpop.f32.mrf.mxu2  ;;  %v2960_v15 = vpop.f32.mrf.mxu3 }
 0x2a5   : > { %v2962_v62 = vpop.eup %2254  ;;  %v662_v26 = vmax.f32 %v2958_v10, %v2960_v15  ;;  %v787_v9 = vmul.f32 1.442695, %v703_v61  ;;  %v789_v1 = vmul.f32 1.442695, %v704_v25 }
 0x2a6   : > { %v2967_v16 = vpop.eup %2256 }
 0x2a7   : > { %v899_v29 = vadd.f32 %v2967_v16, %v2962_v62  ;;  %v2972_v51 = vpop.eup %2258  ;;  %2262 = vpow2.f32 %v787_v9 }
 0x2a8   : > { %v2974_v12 = vpop.eup %2260  ;;  %2264 = vpow2.f32 %v789_v1 }
 0x2a9   : > { %900 = vadd.xlane.f32.xlu2 %v899_v29  ;;  %663 = vmax.xlane.f32.xlu1 %v662_v26  ;;  %v902_v17 = vadd.f32 %v2974_v12, %v2972_v51 }
 0x2aa   : > { %v622_v34 = vpop.xlane.xlu2 %621 }
 0x2ab   : > { %v705_v13 = vsub.f32 %v2830_v22, %v622_v34  ;;  %v706_v61 = vsub.f32 %v2832_v23, %v622_v34 }
 0x2ac   : > { %v2976_v19 = vpop.f32.mrf.mxu2  ;;  %v2978_v46 = vpop.f32.mrf.mxu3 }
 0x2ad   : > { %v665_v20 = vmax.f32 %v2976_v19, %v2978_v46  ;;  %v791_v26 = vmul.f32 1.442695, %v705_v13  ;;  %v793_v25 = vmul.f32 1.442695, %v706_v61  ;;  %v2986_v45 = vpop.eup %2262  ;;  %v687_v61 = vsub.f32 %v2764_v56, %v2916_v6 }
 0x2ae   : > { %4230 = vst [vmem:[#allocation18_spill] sm:$0xff] %v2986_v45  ;;  %v2990_v43 = vpop.eup %2264 }
 0x2af   : > { %4231 = vst [vmem:[#allocation19_spill] sm:$0xff] %v2990_v43  ;;  %2266 = vpow2.f32 %v791_v26  ;;  %v688_v26 = vsub.f32 %v2766_v57, %v2916_v6 }
 0x2b0   : > { %2268 = vpow2.f32 %v793_v25 }
 0x2b1   : > { %903 = vadd.xlane.f32.xlu1 %v902_v17  ;;  %666 = vmax.xlane.f32.xlu2 %v665_v20  ;;  %v905_v20 = vadd.f32 %v2990_v43, %v2986_v45  ;;  %v757_v57 = vmul.f32 1.442695, %v688_v26 }
 0x2b2   : > { %v625_v29 = vpop.xlane.xlu2 %624 }
 0x2b3   : > { %v707_v9 = vsub.f32 %v2840_v27, %v625_v29  ;;  %v708_v22 = vsub.f32 %v2842_v28, %v625_v29 }
 0x2b4   : > { %v2992_v42 = vpop.f32.mrf.mxu2  ;;  %v2994_v1 = vpop.f32.mrf.mxu3 }
 0x2b5   : > { %v795_v23 = vmul.f32 1.442695, %v707_v9  ;;  %v797_v34 = vmul.f32 1.442695, %v708_v22  ;;  %v668_v13 = vmax.f32 %v2992_v42, %v2994_v1  ;;  %v3000_v28 = vpop.eup %2266 }
 0x2b6   : > { %4232 = vst [vmem:[#allocation20_spill] sm:$0xff] %v3000_v28  ;;  %v3004_v17 = vpop.eup %2268 }
 0x2b7   : > { %2270 = vpow2.f32 %v795_v23  ;;  %4233 = vst [vmem:[#allocation21_spill] sm:$0xff] %v3004_v17 }
 0x2b8   : > { %2272 = vpow2.f32 %v797_v34 }
 0x2b9   : > { %906 = vadd.xlane.f32.xlu2 %v905_v20  ;;  %669 = vmax.xlane.f32.xlu1 %v668_v13  ;;  %v755_v13 = vmul.f32 1.442695, %v687_v61  ;;  %v908_v20 = vadd.f32 %v3004_v17, %v3000_v28 }
 0x2ba   : > { %v628_v27 = vpop.xlane.xlu2 %627 }
 0x2bb   : > { %v709_v22 = vsub.f32 %v2846_v30, %v628_v27  ;;  %v710_v34 = vsub.f32 %v2848_v31, %v628_v27  ;;  %2274 = vpow2.f32 %v755_v13 }
 0x2bc   : > { %v3008_v29 = vpop.f32.mrf.mxu2  ;;  %v3010_v25 = vpop.f32.mrf.mxu3  ;;  %2276 = vpow2.f32 %v757_v57 }
 0x2bd   : > { %v3012_v9 = vpop.eup %2270  ;;  %v799_v6 = vmul.f32 1.442695, %v709_v22  ;;  %v801_v8 = vmul.f32 1.442695, %v710_v34  ;;  %v671_v26 = vmax.f32 %v3008_v29, %v3010_v25 }
 0x2be   : > { %4234 = vst [vmem:[#allocation22_spill] sm:$0xff] %v3012_v9  ;;  %v3015_v23 = vpop.eup %2272 }
 0x2bf   : > { %4235 = vst [vmem:[#allocation23_spill] sm:$0xff] %v3015_v23  ;;  %v911_v56 = vadd.f32 %v3015_v23, %v3012_v9  ;;  %2278 = vpow2.f32 %v799_v6 }
 0x2c0   : > { %2280 = vpow2.f32 %v801_v8  ;;  %v693_v8 = vsub.f32 %v2780_v63, %v2892_v18 }
 0x2c1   : > { %912 = vadd.xlane.f32.xlu2 %v911_v56  ;;  %909 = vadd.xlane.f32.xlu1 %v908_v20  ;;  %v3032_v22 = vpop.eup %2274 }
 0x2c2   : > { %v631_v7 = vpop.xlane.xlu1 %630  ;;  %4236 = vst [vmem:[#allocation24_spill] sm:$0xff] %v3032_v22  ;;  %v3034_v13 = vpop.eup %2276  ;;  %v767_v6 = vmul.f32 1.442695, %v693_v8 }
 0x2c3   : > { %v711_v31 = vsub.f32 %v2854_v36, %v631_v7  ;;  %v712_v61 = vsub.f32 %v2856_v37, %v631_v7  ;;  %4237 = vst [vmem:[#allocation25_spill] sm:$0xff] %v3034_v13  ;;  %v694_v37 = vsub.f32 %v2782_v0, %v2892_v18  ;;  %v881_v57 = vadd.f32 %v3034_v13, %v3032_v22 }
 0x2c4   : > { %v3022_v30 = vpop.f32.mrf.mxu2  ;;  %v3024_v43 = vpop.f32.mrf.mxu3 }
 0x2c5   : > { %v674_v27 = vmax.f32 %v3022_v30, %v3024_v43  ;;  %v803_v34 = vmul.f32 1.442695, %v711_v31  ;;  %v805_v56 = vmul.f32 1.442695, %v712_v61  ;;  %v3036_v20 = vpop.eup %2278 }
 0x2c6   : > { %v3038_v36 = vpop.eup %2280 }
 0x2c7   : > { %2282 = vpow2.f32 %v803_v34  ;;  %v914_v7 = vadd.f32 %v3038_v36, %v3036_v20 }
 0x2c8   : > { %2284 = vpow2.f32 %v805_v56 }
 0x2c9   : > { %672 = vmax.xlane.f32.xlu1 %v671_v26  ;;  %675 = vmax.xlane.f32.xlu2 %v674_v27  ;;  %v769_v27 = vmul.f32 1.442695, %v694_v37  ;;  %2286 = vpow2.f32 %v767_v6 }
 0x2ca   : > { %v634_v31 = vpop.xlane.xlu1 %633 }
 0x2cb   : > { %v713_v0 = vsub.f32 %v2860_v39, %v634_v31  ;;  %2288 = vpow2.f32 %v769_v27  ;;  %v714_v56 = vsub.f32 %v2862_v40, %v634_v31 }
 0x2cc   : > { %v3048_v61 = vpop.f32.mrf.mxu2  ;;  %v3050_v26 = vpop.f32.mrf.mxu3 }
 0x2cd   : > { %v3052_v63 = vpop.eup %2282  ;;  %v677_v18 = vmax.f32 %v3048_v61, %v3050_v26  ;;  %v807_v37 = vmul.f32 1.442695, %v713_v0 }
 0x2ce   : > { %v3054_v34 = vpop.eup %2284 }
 0x2cf   : > { %v917_v8 = vadd.f32 %v3054_v34, %v3052_v63  ;;  %2290 = vpow2.f32 %v807_v37 }
 0x2d1   : > { %915 = vadd.xlane.f32.xlu1 %v914_v7  ;;  %882 = vadd.xlane.f32.xlu2 %v881_v57  ;;  %v809_v7 = vmul.f32 1.442695, %v714_v56  ;;  %v3062_v57 = vpop.eup %2286 }
 0x2d2   : > { %4238 = vst [vmem:[#allocation26_spill] sm:$0xff] %v3062_v57  ;;  %v3064_v13 = vpop.eup %2288  ;;  %v3074_v27 = vpop.xlane.xlu2 %636 }
 0x2d3   : > { %4239 = vst [vmem:[#allocation27_spill] sm:$0xff] %v3064_v13  ;;  %2292 = vpow2.f32 %v809_v7  ;;  %v890_v40 = vadd.f32 %v3064_v13, %v3062_v57 }
 0x2d4   : > { %v3066_v6 = vpop.f32.mrf.mxu2  ;;  %v3068_v39 = vpop.f32.mrf.mxu3  ;;  %4240 = vst [vmem:[#allocation28_spill] sm:$0xff] %v3074_v27 }
 0x2d5   : > { %v680_v31 = vmax.f32 %v3066_v6, %v3068_v39  ;;  %v3076_v0 = vpop.eup %2290 }
 0x2d9   : > { %918 = vadd.xlane.f32.xlu2 %v917_v8  ;;  %678 = vmax.xlane.f32.xlu1 %v677_v18  ;;  %v3078_v18 = vpop.eup %2292 }
 0x2da   : > { %v920_v56 = vadd.f32 %v3078_v18, %v3076_v0  ;;  %v3084_v37 = vpop.xlane.xlu1 %639 }
 0x2db   : > { %4241 = vst [vmem:[#allocation29_spill] sm:$0xff] %v3084_v37 }
 0x2e1   : > { %891 = vadd.xlane.f32.xlu1 %v890_v40  ;;  %681 = vmax.xlane.f32.xlu2 %v680_v31 }
 0x2e2   : > { %v3082_v8 = vpop.xlane.xlu2 %642 }
 0x2e9   : > { %921 = vadd.xlane.f32.xlu1 %v920_v56 }
 0x2ea   : > { %v3088_v22 = vpop.xlane.xlu1 %645 }
 0x2eb   : > { %4242 = vst [vmem:[#allocation30_spill] sm:$0xff] %v3088_v22 }
 0x2f2   : > { %v3086_v7 = vpop.xlane.xlu2 %648 }
 0x2fa   : > { %v3090_v40 = vpop.xlane.xlu2 %888  ;;  %v3092_v31 = vpop.xlane.xlu1 %651 }
 0x2fb   : > { %4243 = vst [vmem:[#allocation31_spill] sm:$0xff] %v3090_v40 }
 0x2fc   : > { %4244 = vst [vmem:[#allocation32_spill] sm:$0xff] %v3092_v31 }
 0x302   : > { %v3094_v13 = vpop.xlane.xlu2 %654 }
 0x30a   : > { %v895_v57 = vpop.xlane.xlu2 %894  ;;  %v3096_v27 = vpop.xlane.xlu1 %657 }
 0x30b   : > { %2294 = vrcp.f32 %v895_v57 }
 0x311   : > { %v2295_v40 = vpop.eup %2294 }
 0x312   : > { %v661_v45 = vpop.xlane.xlu2 %660  ;;  %v3101_v23 = vmul.f32 %v2295_v40, %v2926_v60 }
 0x313   : > { %v731_v56 = vsub.f32 %v2944_v50, %v661_v45  ;;  %v732_v17 = vsub.f32 %v2946_v41, %v661_v45  ;;  %v3107_v50 = vmul.f32 %v2295_v40, %v2928_v35 }
 0x314   : > { %v898_v37 = vpop.xlane.xlu1 %897 }
 0x315   : > { %v843_v28 = vmul.f32 1.442695, %v731_v56  ;;  %v845_v47 = vmul.f32 1.442695, %v732_v17  ;;  %2296 = vrcp.f32 %v898_v37 }
 0x317   : > { %2298 = vpow2.f32 %v843_v28 }
 0x318   : > { %2300 = vpow2.f32 %v845_v47 }
 0x31b   : > { %v2297_v22 = vpop.eup %2296 }
 0x31c   : > { %v901_v44 = vpop.xlane.xlu2 %900  ;;  %v664_v31 = vpop.xlane.xlu1 %663  ;;  %v3104_v9 = vmul.f32 %v2297_v22, %v2948_v2  ;;  %v3110_v45 = vmul.f32 %v2297_v22, %v2953_v33 }
 0x31d   : > { %v3112_v41 = vpop.eup %2298  ;;  %v733_v47 = vsub.f32 %v2958_v10, %v664_v31  ;;  %v734_v28 = vsub.f32 %v2960_v15, %v664_v31 }
 0x31e   : > { %v3116_v17 = vpop.eup %2300 }
 0x31f   : > { %v847_v57 = vmul.f32 1.442695, %v733_v47  ;;  %v849_v35 = vmul.f32 1.442695, %v734_v28  ;;  %v947_v33 = vadd.f32 %v3116_v17, %v3112_v41 }
 0x321   : > { %2302 = vpow2.f32 %v847_v57  ;;  %948 = vadd.xlane.f32.xlu2 %v947_v33 }
 0x322   : > { %2304 = vpow2.f32 %v849_v35 }
 0x323   : > { %2306 = vrcp.f32 %v901_v44 }
 0x324   : > { %v904_v10 = vpop.xlane.xlu1 %903  ;;  %v667_v22 = vpop.xlane.xlu2 %666 }
 0x325   : > { %2308 = vrcp.f32 %v904_v10  ;;  %v735_v15 = vsub.f32 %v2976_v19, %v667_v22  ;;  %v736_v37 = vsub.f32 %v2978_v46, %v667_v22 }
 0x327   : > { %v3126_v40 = vpop.eup %2302  ;;  %v851_v31 = vmul.f32 1.442695, %v735_v15  ;;  %v853_v56 = vmul.f32 1.442695, %v736_v37 }
 0x328   : > { %v3128_v47 = vpop.eup %2304 }
 0x329   : > { %v2307_v28 = vpop.eup %2306  ;;  %2310 = vpow2.f32 %v851_v31  ;;  %v950_v57 = vadd.f32 %v3128_v47, %v3126_v40 }
 0x32a   : > { %2312 = vpow2.f32 %v853_v56  ;;  %v3135_v19 = vmul.f32 %v2307_v28, %v2962_v62  ;;  %v3141_v10 = vmul.f32 %v2307_v28, %v2967_v16 }
 0x32b   : > { %v2309_v44 = vpop.eup %2308  ;;  %951 = vadd.xlane.f32.xlu1 %v950_v57 }
 0x32c   : > { %v3132_v35 = vpop.xlane.xlu2 %906  ;;  %v670_v33 = vpop.xlane.xlu1 %669  ;;  %v3138_v46 = vmul.f32 %v2309_v44, %v2972_v51  ;;  %v3144_v22 = vmul.f32 %v2309_v44, %v2974_v12 }
 0x32d   : > { %v737_v15 = vsub.f32 %v2992_v42, %v670_v33  ;;  %v738_v37 = vsub.f32 %v2994_v1, %v670_v33 }
 0x32f   : > { %v3152_v56 = vpop.eup %2310  ;;  %v855_v51 = vmul.f32 1.442695, %v737_v15  ;;  %v857_v57 = vmul.f32 1.442695, %v738_v37 }
 0x330   : > { %4245 = vst [vmem:[#allocation33_spill] sm:$0xff] %v3152_v56  ;;  %v3154_v2 = vpop.eup %2312 }
 0x331   : > { %4246 = vst [vmem:[#allocation34_spill] sm:$0xff] %v3154_v2  ;;  %2314 = vpow2.f32 %v855_v51  ;;  %v953_v16 = vadd.f32 %v3154_v2, %v3152_v56 }
 0x332   : > { %2316 = vpow2.f32 %v857_v57 }
 0x333   : > { %954 = vadd.xlane.f32.xlu2 %v953_v16 }
 0x334   : > { %v3158_v42 = vpop.xlane.xlu2 %912  ;;  %v3160_v12 = vpop.xlane.xlu1 %909 }
 0x337   : > { %v3162_v1 = vpop.eup %2314 }
 0x338   : > { %4247 = vst [vmem:[#allocation35_spill] sm:$0xff] %v3162_v1  ;;  %v3164_v28 = vpop.eup %2316 }
 0x339   : > { %4248 = vst [vmem:[#allocation36_spill] sm:$0xff] %v3164_v28  ;;  %v956_v44 = vadd.f32 %v3164_v28, %v3162_v1 }
 0x33b   : > { %957 = vadd.xlane.f32.xlu1 %v956_v44 }
 0x33c   : > { %v673_v33 = vpop.xlane.xlu1 %672  ;;  %v676_v15 = vpop.xlane.xlu2 %675 }
 0x33d   : > { %v739_v37 = vsub.f32 %v3008_v29, %v673_v33  ;;  %v740_v51 = vsub.f32 %v3010_v25, %v673_v33  ;;  %v741_v57 = vsub.f32 %v3022_v30, %v676_v15  ;;  %v742_v16 = vsub.f32 %v3024_v43, %v676_v15 }
 0x33e   : > { %v727_v15 = vsub.f32 %v2920_v4, %v3094_v13  ;;  %v684_v4 = vsub.f32 %v2756_v53, %v2930_v38 }
 0x33f   : > { %v859_v60 = vmul.f32 1.442695, %v739_v37  ;;  %v861_v62 = vmul.f32 1.442695, %v740_v51  ;;  %v863_v31 = vmul.f32 1.442695, %v741_v57  ;;  %v728_v57 = vsub.f32 %v2922_v5, %v3094_v13 }
 0x340   : > { %v865_v2 = vmul.f32 1.442695, %v742_v16  ;;  %v835_v16 = vmul.f32 1.442695, %v727_v15  ;;  %v689_v5 = vsub.f32 %v2768_v58, %v2904_v32  ;;  %v749_v53 = vmul.f32 1.442695, %v684_v4 }
 0x341   : > { %2318 = vpow2.f32 %v859_v60  ;;  %v837_v1 = vmul.f32 1.442695, %v728_v57  ;;  %v723_v57 = vsub.f32 %v2894_v21, %v3086_v7 }
 0x342   : > { %2320 = vpow2.f32 %v861_v62 }
 0x343   : > { %2322 = vpow2.f32 %v863_v31 }
 0x344   : > { %2324 = vpow2.f32 %v865_v2  ;;  %v916_v56 = vpop.xlane.xlu1 %915  ;;  %v3172_v44 = vpop.xlane.xlu2 %882 }
 0x347   : > { %v3174_v28 = vpop.eup %2318 }
 0x348   : > { %v3176_v29 = vpop.eup %2320 }
 0x349   : > { %v3178_v25 = vpop.eup %2322  ;;  %v959_v43 = vadd.f32 %v3176_v29, %v3174_v28 }
 0x34a   : > { %v3182_v30 = vpop.eup %2324 }
 0x34b   : > { %v962_v60 = vadd.f32 %v3182_v30, %v3178_v25  ;;  %960 = vadd.xlane.f32.xlu2 %v959_v43  ;;  %v683_v43 = vsub.f32 %v2754_v52, %v2930_v38  ;;  %v759_v38 = vmul.f32 1.442695, %v689_v5 }
 0x34c   : > { %v919_v31 = vpop.xlane.xlu2 %918  ;;  %v679_v2 = vpop.xlane.xlu1 %678 }
 0x34d   : > { %963 = vadd.xlane.f32.xlu1 %v962_v60  ;;  %v743_v62 = vsub.f32 %v3048_v61, %v679_v2  ;;  %v744_v33 = vsub.f32 %v3050_v26, %v679_v2  ;;  %v747_v15 = vmul.f32 1.442695, %v683_v43 }
 0x34f   : > { %v867_v37 = vmul.f32 1.442695, %v743_v62  ;;  %v869_v51 = vmul.f32 1.442695, %v744_v33 }
 0x351   : > { %2326 = vpow2.f32 %v867_v37  ;;  %v690_v37 = vsub.f32 %v2770_v59, %v2904_v32  ;;  %v724_v32 = vsub.f32 %v2896_v24, %v3086_v7 }
 0x352   : > { %2328 = vpow2.f32 %v869_v51 }
 0x353   : > { %2330 = vpow2.f32 %v835_v16  ;;  %v761_v58 = vmul.f32 1.442695, %v690_v37  ;;  %v730_v16 = vsub.f32 %v2936_v11, %v3096_v27  ;;  %v685_v37 = vsub.f32 %v2758_v54, %v2918_v14 }
 0x354   : > { %v3194_v60 = vpop.xlane.xlu1 %891  ;;  %v682_v61 = vpop.xlane.xlu2 %681  ;;  %2332 = vpow2.f32 %v837_v1 }
 0x355   : > { %v745_v26 = vsub.f32 %v3066_v6, %v682_v61  ;;  %v746_v2 = vsub.f32 %v3068_v39, %v682_v61  ;;  %v827_v61 = vmul.f32 1.442695, %v723_v57  ;;  %v841_v5 = vmul.f32 1.442695, %v730_v16  ;;  %v4250_v16 = vld [vmem:[#allocation23_spill] sm:$0xff] }
 0x357   : > { %v3200_v62 = vpop.eup %2326  ;;  %v871_v13 = vmul.f32 1.442695, %v745_v26  ;;  %v873_v33 = vmul.f32 1.442695, %v746_v2  ;;  %v829_v2 = vmul.f32 1.442695, %v724_v32 }
 0x358   : > { %v3204_v52 = vpop.eup %2328  ;;  %v4249_v32 = vld [vmem:[#allocation22_spill] sm:$0xff] }
 0x359   : > { %2334 = vpow2.f32 %v871_v13  ;;  %v965_v6 = vadd.f32 %v3204_v52, %v3200_v62  ;;  %v3210_v51 = vpop.eup %2330 }
 0x35a   : > { %2336 = vpow2.f32 %v873_v33  ;;  %v3214_v59 = vpop.eup %2332 }
 0x35b   : > { %2338 = vrcp.f32 %v919_v31  ;;  %966 = vadd.xlane.f32.xlu2 %v965_v6  ;;  %v729_v31 = vsub.f32 %v2934_v3, %v3096_v27  ;;  %v941_v26 = vadd.f32 %v3214_v59, %v3210_v51 }
 0x35c   : > { %2340 = vpow2.f32 %v747_v15  ;;  %v922_v39 = vpop.xlane.xlu1 %921 }
 0x35d   : > { %2342 = vrcp.f32 %v922_v39  ;;  %v839_v3 = vmul.f32 1.442695, %v729_v31 }
 0x35e   : > { %2344 = vpow2.f32 %v749_v53 }
 0x35f   : > { %v3218_v1 = vpop.eup %2334  ;;  %2346 = vpow2.f32 %v759_v38 }
 0x360   : > { %v3224_v43 = vpop.eup %2336  ;;  %2348 = vpow2.f32 %v761_v58 }
 0x361   : > { %v2339_v21 = vpop.eup %2338  ;;  %2350 = vrcp.f32 %v916_v56  ;;  %v968_v24 = vadd.f32 %v3224_v43, %v3218_v1 }
 0x362   : > { %v3230_v7 = vpop.eup %2340  ;;  %2352 = vrcp.f32 %v3158_v42  ;;  %v1031_v27 = vmul.f32 %v2339_v21, %v3052_v63  ;;  %v1032_v13 = vmul.f32 %v2339_v21, %v3054_v34  ;;  %v686_v42 = vsub.f32 %v2760_v55, %v2918_v14 }
 0x363   : > { %v2343_v4 = vpop.eup %2342  ;;  %942 = vadd.xlane.f32.xlu2 %v941_v26  ;;  %969 = vadd.xlane.f32.xlu1 %v968_v24  ;;  %2354 = vpow2.f32 %v827_v61  ;;  %v719_v34 = vsub.f32 %v2878_v48, %v3082_v8 }
 0x364   : > { %v3233_v11 = vpop.eup %2344  ;;  %v1033_v56 = vmul.f32 %v2343_v4, %v3076_v0  ;;  %v1034_v33 = vmul.f32 %v2343_v4, %v3078_v18  ;;  %2356 = vpow2.f32 %v829_v2  ;;  %v720_v0 = vsub.f32 %v2880_v49, %v3082_v8  ;;  %v4252_v2 = vld [vmem:[#allocation16_spill] sm:$0xff] }
 0x365   : > { %v3239_v15 = vpop.eup %2346  ;;  %2358 = vpow2.f32 %v839_v3  ;;  %v751_v18 = vmul.f32 1.442695, %v685_v37  ;;  %v875_v55 = vadd.f32 %v3233_v11, %v3230_v7  ;;  %v753_v58 = vmul.f32 1.442695, %v686_v42  ;;  %v4253_v3 = vld [vmem:[#allocation17_spill] sm:$0xff] }
 0x366   : > { %v3243_v6 = vpop.eup %2348  ;;  %v1081_v53 = vpack.c.bf16 %v1033_v56, %v1031_v27  ;;  %v1082_v63 = vpack.c.bf16 %v1034_v33, %v1032_v13  ;;  %2360 = vpow2.f32 %v841_v5  ;;  %v819_v49 = vmul.f32 1.442695, %v719_v34  ;;  %v4254_v33 = vld [vmem:[#allocation20_spill] sm:$0xff]  ;;  %v4255_v42 = vld [vmem:[#allocation21_spill] sm:$0xff] }
 0x367   : > { %v2351_v38 = vpop.eup %2350  ;;  %2362 = vrcp.f32 %v3160_v12  ;;  %v884_v14 = vadd.f32 %v3243_v6, %v3239_v15  ;;  %v821_v12 = vmul.f32 1.442695, %v720_v0 }
 0x368   : > { %1106 = vmatpush.bf16.xpose.msra.mxu0 %v1081_v53  ;;  %1119 = vmatpush.bf16.xpose.msra.mxu1 %v1082_v63  ;;  %v2353_v54 = vpop.eup %2352  ;;  %v1029_v48 = vmul.f32 %v2351_v38, %v3036_v20  ;;  %v1030_v39 = vmul.f32 %v2351_v38, %v3038_v36  ;;  %2364 = vrcp.f32 %v3132_v35  ;;  %v4251_v35 = vld [vmem:[#allocation32_spill] sm:$0xff] }
 0x369   : > { %v3258_v57 = vpop.eup %2354  ;;  %v1027_v31 = vmul.f32 %v2353_v54, %v4249_v32  ;;  %v1028_v21 = vmul.f32 %v2353_v54, %v4250_v16  ;;  %2366 = vpow2.f32 %v751_v18  ;;  %v725_v4 = vsub.f32 %v4252_v2, %v4251_v35  ;;  %v4256_v54 = vld [vmem:[#allocation18_spill] sm:$0xff]  ;;  %v4259_v32 = vld [vmem:[#allocation12_spill] sm:$0xff]  ;;  %v4260_v16 = vld [vmem:[#allocation13_spill] sm:$0xff] }
 0x36a   : > { %v3261_v8 = vpop.eup %2356  ;;  %2368 = vpow2.f32 %v753_v58  ;;  %v726_v5 = vsub.f32 %v4253_v3, %v4251_v35  ;;  %v4261_v3 = vld [vmem:[#allocation28_spill] sm:$0xff] }
 0x36b   : > { %876 = vadd.xlane.f32.xlu2 %v875_v55  ;;  %885 = vadd.xlane.f32.xlu1 %v884_v14  ;;  %v3265_v61 = vpop.eup %2358  ;;  %v1079_v36 = vpack.c.bf16 %v1029_v48, %v1027_v31  ;;  %v1080_v26 = vpack.c.bf16 %v1030_v39, %v1028_v21  ;;  %2370 = vpow2.f32 %v819_v49  ;;  %v935_v56 = vadd.f32 %v3261_v8, %v3258_v57  ;;  %v4257_v55 = vld [vmem:[#allocation19_spill] sm:$0xff] }
 0x36c   : > { %v3267_v20 = vpop.eup %2360  ;;  %2372 = vpow2.f32 %v821_v12  ;;  %v831_v38 = vmul.f32 1.442695, %v725_v4  ;;  %v833_v0 = vmul.f32 1.442695, %v726_v5  ;;  %v4258_v12 = vld [vmem:[#allocation30_spill] sm:$0xff]  ;;  %v4262_v5 = vld [vmem:[#allocation8_spill] sm:$0xff] }
 0x36d   : > { %v2363_v24 = vpop.eup %2362  ;;  %v944_v13 = vadd.f32 %v3267_v20, %v3265_v61  ;;  %v721_v31 = vsub.f32 %v4259_v32, %v4258_v12  ;;  %v722_v21 = vsub.f32 %v4260_v16, %v4258_v12  ;;  %v4272_v32 = vld [vmem:[#allocation26_spill] sm:$0xff]  ;;  %v4273_v16 = vld [vmem:[#allocation27_spill] sm:$0xff] }
 0x36e   : > { %v2365_v27 = vpop.eup %2364  ;;  %v1025_v37 = vmul.f32 %v2363_v24, %v4254_v33  ;;  %v1026_v53 = vmul.f32 %v2363_v24, %v4255_v42  ;;  %2374 = vpow2.f32 %v831_v38  ;;  %v4264_v33 = vpack.c.bf16 %v3138_v46, %v3135_v19  ;;  %v4266_v38 = vld [vmem:[#allocation31_spill] sm:$0xff]  ;;  %v4267_v46 = vld [vmem:[#allocation29_spill] sm:$0xff] }
 0x36f   : > { %v3279_v63 = vpop.eup %2366  ;;  %v1023_v18 = vmul.f32 %v2365_v27, %v4256_v54  ;;  %v1024_v14 = vmul.f32 %v2365_v27, %v4257_v55  ;;  %2376 = vpow2.f32 %v833_v0  ;;  %v823_v24 = vmul.f32 1.442695, %v721_v31  ;;  %v4268_v55 = vld [vmem:[#allocation10_spill] sm:$0xff] }
 0x370   : > { %1107 = vmatpush.bf16.xpose.msra.mxu0 %v1079_v36  ;;  %1120 = vmatpush.bf16.xpose.msra.mxu1 %v1080_v26  ;;  %v3281_v34 = vpop.eup %2368  ;;  %v825_v35 = vmul.f32 1.442695, %v722_v21  ;;  %v715_v27 = vsub.f32 %v4262_v5, %v4261_v3 }
 0x371   : > { %v3285_v58 = vpop.eup %2370  ;;  %v1077_v39 = vpack.c.bf16 %v1025_v37, %v1023_v18  ;;  %v1078_v49 = vpack.c.bf16 %v1026_v53, %v1024_v14  ;;  %v878_v26 = vadd.f32 %v3281_v34, %v3279_v63  ;;  %2378 = vpow2.f32 %v823_v24  ;;  %v4274_v24 = vld [vmem:[#allocation14_spill] sm:$0xff] }
 0x372   : > { %v3287_v48 = vpop.eup %2372  ;;  %2380 = vpow2.f32 %v825_v35  ;;  %v4265_v37 = vpack.c.bf16 %v3144_v22, %v3141_v10  ;;  %v811_v53 = vmul.f32 1.442695, %v715_v27  ;;  %v717_v10 = vsub.f32 %v4268_v55, %v4267_v46  ;;  %v4269_v22 = vld [vmem:[#allocation11_spill] sm:$0xff]  ;;  %v253_v27 = vld [vmem:[%s4142_s2 + $0x8] sm:$0xf] }
 0x373   : > { %936 = vadd.xlane.f32.xlu2 %v935_v56  ;;  %945 = vadd.xlane.f32.xlu1 %v944_v13  ;;  %v929_v36 = vadd.f32 %v3287_v48, %v3285_v58  ;;  %v4263_v56 = vld [vmem:[#allocation9_spill] sm:$0xff]  ;;  %2382 = vrcp.f32 %v3194_v60  ;;  %v718_v60 = vsub.f32 %v4269_v22, %v4267_v46  ;;  %v4270_v14 = vpack.c.bf16 %v3104_v9, %v3101_v23 }
 0x374   : > { %v3297_v2 = vpop.eup %2374  ;;  %v716_v13 = vsub.f32 %v4263_v56, %v4261_v3  ;;  %2384 = vrcp.f32 %v4266_v38  ;;  %v4275_v3 = vld [vmem:[#allocation15_spill] sm:$0xff] }
 0x375   : > { %v3299_v4 = vpop.eup %2376  ;;  %2386 = vpow2.f32 %v811_v53 }
 0x376   : > { %v938_v42 = vadd.f32 %v3299_v4, %v3297_v2  ;;  %v813_v0 = vmul.f32 1.442695, %v716_v13 }
 0x377   : > { %v3315_v54 = vpop.eup %2378 }
 0x378   : > { %1108 = vmatpush.bf16.xpose.msra.mxu0 %v1077_v39  ;;  %1121 = vmatpush.bf16.xpose.msra.mxu1 %v1078_v49  ;;  %v3317_v18 = vpop.eup %2380  ;;  %2388 = vpow2.f32 %v813_v0  ;;  %v4271_v39 = vpack.c.bf16 %v3110_v45, %v3107_v50 }
 0x379   : > { %v2383_v19 = vpop.eup %2382  ;;  %v932_v12 = vadd.f32 %v3317_v18, %v3315_v54 }
 0x37a   : > { %v2385_v49 = vpop.eup %2384  ;;  %v1013_v31 = vmul.f32 %v2383_v19, %v4272_v32  ;;  %v1014_v21 = vmul.f32 %v2383_v19, %v4273_v16 }
 0x37b   : > { %930 = vadd.xlane.f32.xlu2 %v929_v36  ;;  %879 = vadd.xlane.f32.xlu1 %v878_v26  ;;  %v815_v36 = vmul.f32 1.442695, %v717_v10  ;;  %v817_v26 = vmul.f32 1.442695, %v718_v60  ;;  %v1011_v35 = vmul.f32 %v2385_v49, %v4274_v24  ;;  %v1012_v9 = vmul.f32 %v2385_v49, %v4275_v3  ;;  %v3335_v23 = vpop.eup %2386 }
 0x37d   : > { %v1071_v50 = vpack.c.bf16 %v1013_v31, %v1011_v35  ;;  %v1072_v45 = vpack.c.bf16 %v1014_v21, %v1012_v9  ;;  %2390 = vpow2.f32 %v815_v36  ;;  %v4277_v31 = vld [vmem:[#allocation3_spill] sm:$0xff]  ;;  %v4278_v9 = vld [vmem:[#allocation24_spill] sm:$0xff] }
 0x37e   : > { %v3337_v5 = vpop.eup %2388  ;;  %2392 = vpow2.f32 %v817_v26 }
 0x37f   : > { %v923_v56 = vadd.f32 %v3337_v5, %v3335_v23 }
 0x380   : > { %1109 = vmatpush.bf16.xpose.msra.mxu0 %v4264_v33  ;;  %1122 = vmatpush.bf16.xpose.msra.mxu1 %v4265_v37 }
 0x383   : > { %939 = vadd.xlane.f32.xlu1 %v938_v42  ;;  %v3344_v13 = vpop.eup %2390 }
 0x384   : > { %v3346_v33 = vpop.eup %2392 }
 0x385   : > { %v926_v37 = vadd.f32 %v3346_v33, %v3344_v13 }
 0x388   : > { %1110 = vmatpush.bf16.xpose.msra.mxu0 %v4270_v14  ;;  %1123 = vmatpush.bf16.xpose.msra.mxu1 %v4271_v39 }
 0x38b   : > { %933 = vadd.xlane.f32.xlu1 %v932_v12 }
 0x390   : > { %1111 = vmatpush.bf16.xpose.msra.mxu0 %v1071_v50  ;;  %1124 = vmatpush.bf16.xpose.msra.mxu1 %v1072_v45 }
 0x393   : > { %924 = vadd.xlane.f32.xlu1 %v923_v56  ;;  %261 = vperm.xlu2 %2240, %v253_v27   ;;  %v4279_v27 = vld [vmem:[#allocation25_spill] sm:$0xff] }
 0x394   : > { %v949_v42 = vpop.xlane.xlu2 %948 }
 0x395   : > { %2394 = vrcp.f32 %v949_v42 }
 0x39b   : > { %927 = vadd.xlane.f32.xlu1 %v926_v37  ;;  %v2395_v38 = vpop.eup %2394 }
 0x39c   : > { %v3351_v19 = vmul.f32 %v2395_v38, %v3112_v41  ;;  %v3357_v55 = vmul.f32 %v2395_v38, %v3116_v17  ;;  %v1159_v17 = vrot.slane %v4277_v31, 1 }
 0x39e   : > { %v952_v53 = vpop.xlane.xlu1 %951 }
 0x39f   : > { %2396 = vrcp.f32 %v952_v53 }
 0x3a0   : > { %2398 = vrcp.f32 %v3172_v44 }
 0x3a5   : > { %v2397_v0 = vpop.eup %2396 }
 0x3a6   : > { %v3354_v46 = vmul.f32 %v2397_v0, %v3126_v40  ;;  %v3360_v10 = vmul.f32 %v2397_v0, %v3128_v47  ;;  %v3366_v14 = vpop.xlane.xlu2 %954  ;;  %v4276_v40 = vld [vmem:[#allocation2_spill] sm:$0xff]  ;;  %v2399_v26 = vpop.eup %2398 }
 0x3a7   : > { %v1158_v32 = vrot.slane %v4276_v40, 1  ;;  %v1007_v50 = vmul.f32 %v2399_v26, %v4278_v9  ;;  %v1008_v56 = vmul.f32 %v2399_v26, %v4279_v27  ;;  %v4280_v26 = vld [vmem:[#allocation6_spill] sm:$0xff]  ;;  %v4281_v9 = vld [vmem:[#allocation7_spill] sm:$0xff] }
 0x3a8   : > { %v1091_v22 = vpack.c.bf16 %v3354_v46, %v3351_v19  ;;  %v1092_v60 = vpack.c.bf16 %v3360_v10, %v3357_v55 }
 0x3ae   : > { %v958_v39 = vpop.xlane.xlu1 %957 }
 0x3be   : > { %v961_v41 = vpop.xlane.xlu2 %960 }
 0x3c0   : > { %v964_v49 = vpop.xlane.xlu1 %963 }
 0x3ce   : > { %v967_v12 = vpop.xlane.xlu2 %966 }
 0x3d5   : > { %1162 = vxpose.binary.xlu1.c.b16.start.end [1/2] (short) %v1159_v17, %v1158_v32, 128 }
 0x3d6   : > { %v970_v16 = vpop.xlane.xlu1 %969  ;;  %v3370_v47 = vpop.xlane.xlu2 %942 }
 0x3de   : > { %v886_v21 = vpop.xlane.xlu1 %885  ;;  %v877_v36 = vpop.xlane.xlu2 %876 }
 0x3df   : > { %2400 = vrcp.f32 %v886_v21 }
 0x3e0   : > { %2402 = vrcp.f32 %v970_v16 }
 0x3e1   : > { %2404 = vrcp.f32 %v877_v36 }
 0x3e2   : > { %2406 = vrcp.f32 %v967_v12 }
 0x3e5   : > { %v2401_v24 = vpop.eup %2400 }
 0x3e6   : > { %v3373_v35 = vpop.xlane.xlu1 %945  ;;  %v3375_v3 = vpop.xlane.xlu2 %936  ;;  %v1009_v45 = vmul.f32 %v2401_v24, %v3239_v15  ;;  %v1010_v37 = vmul.f32 %v2401_v24, %v3243_v6 }
 0x3e7   : > { %v2403_v0 = vpop.eup %2402 }
 0x3e8   : > { %v1069_v42 = vpack.c.bf16 %v1009_v45, %v1007_v50  ;;  %v1070_v53 = vpack.c.bf16 %v1010_v37, %v1008_v56  ;;  %v2405_v40 = vpop.eup %2404  ;;  %v1065_v31 = vmul.f32 %v2403_v0, %v3218_v1  ;;  %v1066_v6 = vmul.f32 %v2403_v0, %v3224_v43 }
 0x3e9   : > { %v2407_v32 = vpop.eup %2406  ;;  %v1003_v21 = vmul.f32 %v2405_v40, %v3230_v7  ;;  %v1004_v12 = vmul.f32 %v2405_v40, %v3233_v11 }
 0x3ea   : > { %1112 = vmatpush.bf16.xpose.msra.mxu0 %v1069_v42  ;;  %1125 = vmatpush.bf16.xpose.msra.mxu1 %v1070_v53  ;;  %v1064_v50 = vmul.f32 %v2407_v32, %v3204_v52 }
 0x3ec   : > { %v1098_v7 = vpack.c.bf16 %v1066_v6, %v1064_v50  ;;  %v4287_v6 = vld [vmem:[#allocation34_spill] sm:$0xff] }
 0x3ee   : > { %v880_v44 = vpop.xlane.xlu1 %879  ;;  %v3381_v38 = vpop.xlane.xlu2 %930 }
 0x3ef   : > { %2408 = vrcp.f32 %v880_v44 }
 0x3f0   : > { %2410 = vrcp.f32 %v961_v41 }
 0x3f1   : > { %2412 = vrcp.f32 %v964_v49  ;;  %v1063_v49 = vmul.f32 %v2407_v32, %v3200_v62 }
 0x3f2   : > { %2414 = vrcp.f32 %v958_v39 }
 0x3f3   : > { %v1097_v56 = vpack.c.bf16 %v1065_v31, %v1063_v49  ;;  %2416 = vrcp.f32 %v3366_v14  ;;  %v4286_v14 = vld [vmem:[#allocation33_spill] sm:$0xff] }
 0x3f4   : > { %2418 = vrcp.f32 %v3373_v35 }
 0x3f5   : > { %v2409_v15 = vpop.eup %2408  ;;  %2420 = vrcp.f32 %v3370_v47 }
 0x3f6   : > { %v262_v17 = vpop.permute.xlu2 %261  ;;  %v1005_v16 = vmul.f32 %v2409_v15, %v3279_v63  ;;  %v1006_v36 = vmul.f32 %v2409_v15, %v3281_v34  ;;  %v2411_v43 = vpop.eup %2410 }
 0x3f7   : > { %v294_v24 = vadd.f32 %v4280_v26, %v262_v17  ;;  %v308_v41 = vadd.f32 %v4281_v9, %v262_v17  ;;  %v2413_v37 = vpop.eup %2412  ;;  %v1059_v34 = vmul.f32 %v2411_v43, %v3174_v28  ;;  %v1060_v52 = vmul.f32 %v2411_v43, %v3176_v29  ;;  %v940_v28 = vpop.xlane.xlu1 %939  ;;  %v4284_v29 = vld [vmem:[#allocation35_spill] sm:$0xff] }
 0x3f8   : > { %v1067_v1 = vpack.c.bf16 %v1005_v16, %v1003_v21  ;;  %v1068_v45 = vpack.c.bf16 %v1006_v36, %v1004_v12  ;;  %v1061_v62 = vmul.f32 %v2413_v37, %v3178_v25  ;;  %v1062_v42 = vmul.f32 %v2413_v37, %v3182_v30  ;;  %v2415_v40 = vpop.eup %2414  ;;  %v4285_v30 = vld [vmem:[#allocation36_spill] sm:$0xff] }
 0x3f9   : > { %v311_v27 = vpack.c.bf16 %v308_v41, %v294_v24  ;;  %v2417_v25 = vpop.eup %2416  ;;  %v1057_v32 = vmul.f32 %v2415_v40, %v4284_v29  ;;  %v1058_v15 = vmul.f32 %v2415_v40, %v4285_v30  ;;  %2422 = vrcp.f32 %v940_v28 }
 0x3fa   : > { %1113 = vmatpush.bf16.xpose.msra.mxu0 %v1067_v1  ;;  %1126 = vmatpush.bf16.xpose.msra.mxu1 %v1068_v45  ;;  %v1095_v0 = vpack.c.bf16 %v1061_v62, %v1059_v34  ;;  %v1096_v39 = vpack.c.bf16 %v1062_v42, %v1060_v52  ;;  %v1055_v31 = vmul.f32 %v2417_v25, %v4286_v14  ;;  %v2419_v36 = vpop.eup %2418  ;;  %2424 = vrcp.f32 %v3375_v3 }
 0x3fb   : > { %v1100_v11 = vunpack.c.l.b16 %v311_v27  ;;  %v1101_v63 = vunpack.c.h.b16 %v311_v27  ;;  %v1056_v17 = vmul.f32 %v2417_v25, %v4287_v6  ;;  %v2421_v26 = vpop.eup %2420  ;;  %v1049_v24 = vmul.f32 %v2419_v36, %v3265_v61 }
 0x3fc   : > { %v1093_v21 = vpack.c.bf16 %v1057_v32, %v1055_v31  ;;  %v1050_v9 = vmul.f32 %v2419_v36, %v3267_v20  ;;  %v1047_v47 = vmul.f32 %v2421_v26, %v3210_v51  ;;  %v1048_v41 = vmul.f32 %v2421_v26, %v3214_v59 }
 0x3fd   : > { %v3398_v53 = vpack.c.b16 %v1100_v11, %v1100_v11  ;;  %v3400_v44 = vpack.c.b16 %v1101_v63, %v1101_v63  ;;  %v1094_v16 = vpack.c.bf16 %v1058_v15, %v1056_v17  ;;  %v4290_v11 = vld [vmem:[#allocation5_spill] sm:$0xff] }
 0x3fe   : > { %v1089_v49 = vpack.c.bf16 %v1049_v24, %v1047_v47  ;;  %v1090_v19 = vpack.c.bf16 %v1050_v9, %v1048_v41 }
 0x3ff   : > { %4282 = vst [vmem:[#allocation22_spill] sm:$0xff] %v3398_v53  ;;  %v934_v12 = vpop.xlane.xlu1 %933  ;;  %v2423_v46 = vpop.eup %2422 }
 0x400   : > { %4283 = vst [vmem:[#allocation23_spill] sm:$0xff] %v3400_v44  ;;  %v2425_v55 = vpop.eup %2424  ;;  %2426 = vrcp.f32 %v934_v12  ;;  %v1045_v10 = vmul.f32 %v2423_v46, %v3297_v2  ;;  %v1046_v61 = vmul.f32 %v2423_v46, %v3299_v4 }
 0x401   : > { %1114 = vmatmul.bf16.vlgmr.msra.gmra.mxu0 %v3398_v53  ;;  %1127 = vmatmul.bf16.vlgmr.msra.gmra.mxu1 %v3400_v44  ;;  %2428 = vrcp.f32 %v3381_v38  ;;  %v1043_v20 = vmul.f32 %v2425_v55, %v3258_v57  ;;  %v4288_v57 = vmov 0  }
 0x402   : > { %1132 = vmatpush.bf16.xpose.msrb.mxu0 %v1097_v56  ;;  %1145 = vmatpush.bf16.xpose.msrb.mxu1 %v1098_v7 }
 0x406   : > { %v2427_v3 = vpop.eup %2426 }
 0x407   : > { %v925_v35 = vpop.xlane.xlu1 %924  ;;  %v2429_v50 = vpop.eup %2428  ;;  %v1041_v1 = vmul.f32 %v2427_v3, %v3315_v54  ;;  %v1042_v2 = vmul.f32 %v2427_v3, %v3317_v18 }
 0x408   : > { %v1039_v4 = vmul.f32 %v2429_v50, %v3285_v58  ;;  %v1040_v38 = vmul.f32 %v2429_v50, %v3287_v48  ;;  %v4289_v48 = vld [vmem:[#allocation4_spill] sm:$0xff] }
 0x40a   : > { %1133 = vmatpush.bf16.xpose.msrb.mxu0 %v1095_v0  ;;  %1146 = vmatpush.bf16.xpose.msrb.mxu1 %v1096_v39  ;;  %v1086_v45 = vpack.c.bf16 %v1042_v2, %v1040_v38 }
 0x40f   : > { %v928_v51 = vpop.xlane.xlu1 %927 }
 0x410   : > { %2430 = vrcp.f32 %v928_v51 }
 0x411   : > { %2432 = vrcp.f32 %v925_v35 }
 0x412   : > { %1134 = vmatpush.bf16.xpose.msrb.mxu0 %v1093_v21  ;;  %1147 = vmatpush.bf16.xpose.msrb.mxu1 %v1094_v16 }
 0x416   : > { %v2431_v43 = vpop.eup %2430 }
 0x417   : > { %v2433_v27 = vpop.eup %2432  ;;  %v1037_v56 = vmul.f32 %v2431_v43, %v3344_v13  ;;  %v1038_v7 = vmul.f32 %v2431_v43, %v3346_v33 }
 0x418   : > { %v1035_v54 = vmul.f32 %v2433_v27, %v3335_v23  ;;  %v1036_v18 = vmul.f32 %v2433_v27, %v3337_v5 }
 0x41a   : > { %1135 = vmatpush.bf16.xpose.msrb.mxu0 %v1091_v22  ;;  %1148 = vmatpush.bf16.xpose.msrb.mxu1 %v1092_v60  ;;  %v1044_v22 = vmul.f32 %v2425_v55, %v3261_v8  ;;  %v1087_v60 = vpack.c.bf16 %v1045_v10, %v1043_v20  ;;  %v1085_v8 = vpack.c.bf16 %v1041_v1, %v1039_v4 }
 0x41b   : > { %v1083_v37 = vpack.c.bf16 %v1037_v56, %v1035_v54  ;;  %v1084_v58 = vpack.c.bf16 %v1038_v7, %v1036_v18 }
 0x41c   : > { %v1088_v59 = vpack.c.bf16 %v1046_v61, %v1044_v22 }
 0x422   : > { %1136 = vmatpush.bf16.xpose.msrb.mxu0 %v1089_v49  ;;  %1149 = vmatpush.bf16.xpose.msrb.mxu1 %v1090_v19 }
 0x428   : > { %2241 = vset.pattern.permute.xlu1 %v4288_v57 }
 0x42a   : > { %1137 = vmatpush.bf16.xpose.msrb.mxu0 %v1087_v60  ;;  %1150 = vmatpush.bf16.xpose.msrb.mxu1 %v1088_v59 }
 0x432   : > { %1138 = vmatpush.bf16.xpose.msrb.mxu0 %v1085_v8  ;;  %1151 = vmatpush.bf16.xpose.msrb.mxu1 %v1086_v45 }
 0x43a   : > { %1139 = vmatpush.bf16.xpose.msrb.mxu0 %v1083_v37  ;;  %1152 = vmatpush.bf16.xpose.msrb.mxu1 %v1084_v58 }
 0x441   : > { %1140 = vmatmul.bf16.vlgmr.msrb.gmra.mxu0 %v3398_v53  ;;  %1153 = vmatmul.bf16.vlgmr.msrb.gmra.mxu1 %v3400_v44 }
 0x442   : > { %1249 = vmatpush.bf16.msra.mxu0 %v4289_v48  ;;  %1338 = vmatpush.bf16.msra.mxu1 %v4290_v11 }
 0x47e   : > { %v1115_v63 = vpop.f32.mrf.mxu0  ;;  %v1128_v13 = vpop.f32.mrf.mxu1 }
 0x47f   : > { %v3439_v34 = vadd.f32 %v1128_v13, %v1115_v63 }
 0x481   : > { %4291 = vst [vmem:[#allocation32_spill] sm:$0xff] %v3439_v34  ;;  %v1170_v33 = vpop.trf.xlu1 }
 0x482   : > { %2175 = vmatmul.msk.bf16.vlgmr.msra.gmra.mxu0 %vm353_vm3, %v1170_v33  ;;  %2191 = vmatmul.msk.bf16.vlgmr.msra.gmra.mxu1 %vm353_vm3, %v1170_v33 }
 0x486   : > { %v1117_v23 = vpop.f32.mrf.mxu0  ;;  %v1130_v5 = vpop.f32.mrf.mxu1 }
 0x489   : > { %v1171_v62 = vpop.trf.xlu1 }
 0x491   : > { %v1172_v52 = vpop.trf.xlu1 }
 0x492   : > { %2176 = vmatmul.msk.bf16.gmra.mxu0 %vm353_vm3, %v1172_v52  ;;  %2192 = vmatmul.msk.bf16.gmra.mxu1 %vm353_vm3, %v1172_v52 }
 0x499   : > { %v1173_v42 = vpop.trf.xlu1 }
 0x4a1   : > { %v1174_v0 = vpop.trf.xlu1 }
 0x4a2   : > { %2177 = vmatmul.msk.bf16.gmra.mxu0 %vm353_vm3, %v1174_v0  ;;  %2193 = vmatmul.msk.bf16.gmra.mxu1 %vm353_vm3, %v1174_v0 }
 0x4a9   : > { %v1175_v39 = vpop.trf.xlu1 }
 0x4b1   : > { %v1176_v40 = vpop.trf.xlu1 }
 0x4b2   : > { %2178 = vmatmul.msk.bf16.gmra.mxu0 %vm353_vm3, %v1176_v40  ;;  %2194 = vmatmul.msk.bf16.gmra.mxu1 %vm353_vm3, %v1176_v40 }
 0x4b9   : > { %v1177_v32 = vpop.trf.xlu1 }
 0x4be   : > { %v1141_v28 = vpop.f32.mrf.mxu0  ;;  %v1154_v25 = vpop.f32.mrf.mxu1 }
 0x4bf   : > { %v3449_v29 = vadd.f32 %v1154_v25, %v1141_v28 }
 0x4c1   : > { %4292 = vst [vmem:[#allocation16_spill] sm:$0xff] %v3449_v29  ;;  %v1178_v14 = vpop.trf.xlu1 }
 0x4c2   : > { %2179 = vmatmul.msk.bf16.gmra.mxu0 %vm353_vm3, %v1178_v14  ;;  %2195 = vmatmul.msk.bf16.gmra.mxu1 %vm353_vm3, %v1178_v14 }
 0x4c6   : > { %v1143_v30 = vpop.f32.mrf.mxu0  ;;  %v1156_v15 = vpop.f32.mrf.mxu1 }
 0x4c9   : > { %v1179_v31 = vpop.trf.xlu1 }
 0x4d1   : > { %v1180_v6 = vpop.trf.xlu1 }
 0x4d2   : > { %2180 = vmatmul.msk.bf16.gmra.mxu0 %vm353_vm3, %v1180_v6  ;;  %2196 = vmatmul.msk.bf16.gmra.mxu1 %vm353_vm3, %v1180_v6 }
 0x4d9   : > { %v1181_v17 = vpop.trf.xlu1 }
 0x4e1   : > { %v1182_v21 = vpop.trf.xlu1 }
 0x4e2   : > { %2181 = vmatmul.msk.bf16.gmra.mxu0 %vm353_vm3, %v1182_v21  ;;  %2197 = vmatmul.msk.bf16.gmra.mxu1 %vm353_vm3, %v1182_v21 }
 0x4e9   : > { %v1183_v16 = vpop.trf.xlu1 }
 0x4f1   : > { %v1184_v12 = vpop.trf.xlu1 }
 0x4f2   : > { %2182 = vmatmul.msk.bf16.gmra.mxu0 %vm353_vm3, %v1184_v12  ;;  %2198 = vmatmul.msk.bf16.gmra.mxu1 %vm353_vm3, %v1184_v12 }
 0x4f9   : > { %v1185_v52 = vpop.trf.xlu1 }
 0x4ff   : > { %v3459_v36 = vpop.f32.mrf.mxu0  ;;  %v3461_v26 = vpop.f32.mrf.mxu1 }
 0x502   : > { %2183 = vmatmul.msk.bf16.gmra.mxu0 %vm353_vm3, %v1171_v62  ;;  %2199 = vmatmul.msk.bf16.gmra.mxu1 %vm353_vm3, %v1171_v62 }
 0x507   : > { %v3465_v24 = vpop.f32.mrf.mxu0  ;;  %v3467_v9 = vpop.f32.mrf.mxu1 }
 0x50f   : > { %v3469_v35 = vpop.f32.mrf.mxu0  ;;  %v3471_v47 = vpop.f32.mrf.mxu1 }
 0x510   : > { %4293 = vst [vmem:[#allocation17_spill] sm:$0xff] %v3469_v35 }
 0x511   : > { %4294 = vst [vmem:[#allocation20_spill] sm:$0xff] %v3471_v47 }
 0x512   : > { %2184 = vmatmul.msk.bf16.gmra.mxu0 %vm353_vm3, %v1173_v42  ;;  %2200 = vmatmul.msk.bf16.gmra.mxu1 %vm353_vm3, %v1173_v42 }
 0x517   : > { %v3475_v41 = vpop.f32.mrf.mxu0  ;;  %v3477_v49 = vpop.f32.mrf.mxu1 }
 0x51f   : > { %v3479_v19 = vpop.f32.mrf.mxu0  ;;  %v3481_v46 = vpop.f32.mrf.mxu1 }
 0x522   : > { %2185 = vmatmul.msk.bf16.gmra.mxu0 %vm353_vm3, %v1175_v39  ;;  %2201 = vmatmul.msk.bf16.gmra.mxu1 %vm353_vm3, %v1175_v39 }
 0x527   : > { %v3485_v55 = vpop.f32.mrf.mxu0  ;;  %v3487_v10 = vpop.f32.mrf.mxu1 }
 0x52f   : > { %v3489_v61 = vpop.f32.mrf.mxu0  ;;  %v3491_v20 = vpop.f32.mrf.mxu1 }
 0x530   : > { %v1438_v62 = vmax.f32 %v3489_v61, %v3491_v20 }
 0x532   : > { %2186 = vmatmul.msk.bf16.gmra.mxu0 %vm353_vm3, %v1177_v32  ;;  %2202 = vmatmul.msk.bf16.gmra.mxu1 %vm353_vm3, %v1177_v32 }
 0x537   : > { %v3495_v22 = vpop.f32.mrf.mxu0  ;;  %v3497_v51 = vpop.f32.mrf.mxu1 }
 0x53f   : > { %v3499_v60 = vpop.f32.mrf.mxu0  ;;  %v3501_v59 = vpop.f32.mrf.mxu1 }
 0x540   : > { %v1444_v3 = vmax.f32 %v3499_v60, %v3501_v59 }
 0x542   : > { %2187 = vmatmul.msk.bf16.gmra.mxu0 %vm353_vm3, %v1179_v31  ;;  %2203 = vmatmul.msk.bf16.gmra.mxu1 %vm353_vm3, %v1179_v31 }
 0x543   : > { %1445 = vmax.xlane.f32.xlu2 %v1444_v3 }
 0x547   : > { %v3507_v50 = vpop.f32.mrf.mxu0  ;;  %v3509_v1 = vpop.f32.mrf.mxu1 }
 0x548   : > { %v1447_v2 = vmax.f32 %v3507_v50, %v3509_v1 }
 0x54a   : > { %1448 = vmax.xlane.f32.xlu0 %v1447_v2 }
 0x54f   : > { %v3513_v4 = vpop.f32.mrf.mxu0  ;;  %v3515_v38 = vpop.f32.mrf.mxu1 }
 0x550   : > { %v1450_v57 = vmax.f32 %v3513_v4, %v3515_v38 }
 0x552   : > { %2188 = vmatmul.msk.bf16.gmra.mxu0 %vm353_vm3, %v1181_v17  ;;  %2204 = vmatmul.msk.bf16.gmra.mxu1 %vm353_vm3, %v1181_v17 }
 0x553   : > { %1451 = vmax.xlane.f32.xlu0 %v1450_v57 }
 0x557   : > { %v3521_v8 = vpop.f32.mrf.mxu0  ;;  %v3523_v45 = vpop.f32.mrf.mxu1 }
 0x558   : > { %v1453_v43 = vmax.f32 %v3521_v8, %v3523_v45 }
 0x55b   : > { %1454 = vmax.xlane.f32.xlu0 %v1453_v43 }
 0x55f   : > { %v3527_v27 = vpop.f32.mrf.mxu0  ;;  %v3529_v56 = vpop.f32.mrf.mxu1 }
 0x560   : > { %v1456_v7 = vmax.f32 %v3527_v27, %v3529_v56 }
 0x562   : > { %2189 = vmatmul.msk.bf16.gmra.mxu0 %vm353_vm3, %v1183_v16  ;;  %2205 = vmatmul.msk.bf16.gmra.mxu1 %vm353_vm3, %v1183_v16 }
 0x563   : > { %1457 = vmax.xlane.f32.xlu0 %v1456_v7 }
 0x567   : > { %v3535_v54 = vpop.f32.mrf.mxu0  ;;  %v3537_v18 = vpop.f32.mrf.mxu1 }
 0x568   : > { %v1459_v37 = vmax.f32 %v3535_v54, %v3537_v18 }
 0x56b   : > { %1460 = vmax.xlane.f32.xlu0 %v1459_v37 }
 0x56f   : > { %v3541_v58 = vpop.f32.mrf.mxu0  ;;  %v3543_v48 = vpop.f32.mrf.mxu1 }
 0x570   : > { %v1462_v11 = vmax.f32 %v3541_v58, %v3543_v48 }
 0x572   : > { %1463 = vmax.xlane.f32.xlu2 %v1462_v11  ;;  %2190 = vmatmul.msk.bf16.gmra.mxu0 %vm353_vm3, %v1185_v52 }
 0x573   : > { %2206 = vmatmul.msk.bf16.gmra.mxu1 %vm353_vm3, %v1185_v52 }
 0x577   : > { %v3547_v63 = vpop.f32.mrf.mxu0  ;;  %v3549_v13 = vpop.f32.mrf.mxu1 }
 0x578   : > { %4295 = vst [vmem:[#allocation21_spill] sm:$0xff] %v3547_v63  ;;  %v1465_v33 = vmax.f32 %v3547_v63, %v3549_v13  ;;  %v1426_v63 = vmax.f32 %v3469_v35, %v3471_v47  ;;  %v1420_v35 = vmax.f32 %v3459_v36, %v3461_v26 }
 0x579   : > { %4296 = vst [vmem:[#allocation18_spill] sm:$0xff] %v3549_v13 }
 0x57a   : > { %1466 = vmax.xlane.f32.xlu0 %v1465_v33 }
 0x57f   : > { %v3553_v23 = vpop.f32.mrf.mxu0  ;;  %v3555_v5 = vpop.f32.mrf.mxu1 }
 0x582   : > { %1439 = vmax.xlane.f32.xlu0 %v1438_v62  ;;  %v1432_v62 = vmax.f32 %v3479_v19, %v3481_v46 }
 0x587   : > { %v3561_v42 = vpop.f32.mrf.mxu0  ;;  %v3563_v0 = vpop.f32.mrf.mxu1 }
 0x58f   : > { %v3565_v39 = vpop.f32.mrf.mxu0  ;;  %v3567_v40 = vpop.f32.mrf.mxu1 }
 0x590   : > { %4297 = vst [vmem:[#allocation19_spill] sm:$0xff] %v3565_v39 }
 0x591   : > { %4298 = vst [vmem:[#allocation30_spill] sm:$0xff] %v3567_v40 }
 0x597   : > { %v3569_v28 = vpop.f32.mrf.mxu0  ;;  %v3571_v25 = vpop.f32.mrf.mxu1 }
 0x59f   : > { %v3573_v32 = vpop.f32.mrf.mxu0  ;;  %v3575_v30 = vpop.f32.mrf.mxu1 }
 0x5a0   : > { %4299 = vst [vmem:[#allocation12_spill] sm:$0xff] %v3573_v32 }
 0x5a1   : > { %4300 = vst [vmem:[#allocation13_spill] sm:$0xff] %v3575_v30 }
 0x5a7   : > { %v3577_v15 = vpop.f32.mrf.mxu0  ;;  %v3579_v14 = vpop.f32.mrf.mxu1 }
 0x5af   : > { %v3581_v31 = vpop.f32.mrf.mxu0  ;;  %v3583_v6 = vpop.f32.mrf.mxu1 }
 0x5b7   : > { %v3585_v17 = vpop.f32.mrf.mxu0  ;;  %v3587_v21 = vpop.f32.mrf.mxu1 }
 0x5bd   : > { %v3603_v37 = vpop.xlane.xlu0 %1448 }
 0x5bf   : > { %v3589_v16 = vpop.f32.mrf.mxu0  ;;  %v3591_v12 = vpop.f32.mrf.mxu1 }
 0x5c0   : > { %4301 = vst [vmem:[#allocation28_spill] sm:$0xff] %v3589_v16  ;;  %v1492_v44 = vmax.f32 %v3589_v16, %v3591_v12 }
 0x5c1   : > { %4302 = vst [vmem:[#allocation8_spill] sm:$0xff] %v3591_v12 }
 0x5c6   : > { %v1452_v52 = vpop.xlane.xlu0 %1451 }
 0x5c7   : > { %v3593_v3 = vpop.f32.mrf.mxu0  ;;  %v3595_v2 = vpop.f32.mrf.mxu1 }
 0x5cf   : > { %v3597_v57 = vpop.f32.mrf.mxu0  ;;  %v3599_v43 = vpop.f32.mrf.mxu1 }
 0x5d0   : > { %4303 = vst [vmem:[#allocation9_spill] sm:$0xff] %v3597_v57  ;;  %v1498_v7 = vmax.f32 %v3597_v57, %v3599_v43  ;;  %v3629_v57 = vpop.xlane.xlu0 %1454 }
 0x5d1   : > { %4304 = vst [vmem:[#allocation31_spill] sm:$0xff] %v3599_v43  ;;  %v1441_v43 = vmax.f32 %v3495_v22, %v3497_v51 }
 0x5d2   : > { %1499 = vmax.xlane.f32.xlu0 %v1498_v7 }
 0x5d7   : > { %v3605_v11 = vpop.f32.mrf.mxu0  ;;  %v3607_v33 = vpop.f32.mrf.mxu1 }
 0x5d8   : > { %v1458_v12 = vpop.xlane.xlu0 %1457 }
 0x5d9   : > { %v1540_v16 = vsub.f32 %v3527_v27, %v1458_v12  ;;  %v1541_v47 = vsub.f32 %v3529_v56, %v1458_v12  ;;  %v1495_v27 = vmax.f32 %v3593_v3, %v3595_v2  ;;  %v1446_v56 = vpop.xlane.xlu2 %1445 }
 0x5da   : > { %1433 = vmax.xlane.f32.xlu0 %v1432_v62 }
 0x5df   : > { %v3611_v29 = vpop.f32.mrf.mxu0  ;;  %v3613_v34 = vpop.f32.mrf.mxu1 }
 0x5e0   : > { %v1504_v7 = vmax.f32 %v3611_v29, %v3613_v34 }
 0x5e2   : > { %1493 = vmax.xlane.f32.xlu0 %v1492_v44  ;;  %1505 = vmax.xlane.f32.xlu2 %v1504_v7  ;;  %v1486_v44 = vmax.f32 %v3581_v31, %v3583_v6  ;;  %v1501_v7 = vmax.f32 %v3605_v11, %v3607_v33 }
 0x5e7   : > { %v3619_v53 = vpop.f32.mrf.mxu0  ;;  %v3621_v13 = vpop.f32.mrf.mxu1 }
 0x5e8   : > { %v1507_v62 = vmax.f32 %v3619_v53, %v3621_v13 }
 0x5ea   : > { %1427 = vmax.xlane.f32.xlu0 %v1426_v63  ;;  %1442 = vmax.xlane.f32.xlu2 %v1441_v43  ;;  %v1435_v63 = vmax.f32 %v3485_v55, %v3487_v10  ;;  %v1628_v43 = vmul.f32 1.442695, %v1540_v16  ;;  %v1536_v16 = vsub.f32 %v3513_v4, %v1452_v52  ;;  %v1474_v4 = vmax.f32 %v3565_v39, %v3567_v40 }
 0x5eb   : > { %1508 = vmax.xlane.f32.xlu1 %v1507_v62  ;;  %v1630_v62 = vmul.f32 1.442695, %v1541_v47 }
 0x5ec   : > { %2434 = vpow2.f32 %v1628_v43  ;;  %v1620_v43 = vmul.f32 1.442695, %v1536_v16 }
 0x5ed   : > { %2436 = vpow2.f32 %v1630_v62 }
 0x5ee   : > { %2438 = vpow2.f32 %v1620_v43 }
 0x5ef   : > { %v3669_v43 = vpop.f32.mrf.mxu0 }
 0x5f2   : > { %1487 = vmax.xlane.f32.xlu0 %v1486_v44  ;;  %1502 = vmax.xlane.f32.xlu2 %v1501_v7  ;;  %v1480_v44 = vmax.f32 %v3573_v32, %v3575_v30  ;;  %v3645_v12 = vpop.eup %2434 }
 0x5f3   : > { %v3647_v7 = vpop.eup %2436 }
 0x5f4   : > { %v1744_v47 = vadd.f32 %v3647_v7, %v3645_v12 }
 0x5f7   : > { %v3687_v40 = vpop.f32.mrf.mxu0 }
 0x5fa   : > { %1421 = vmax.xlane.f32.xlu0 %v1420_v35  ;;  %1436 = vmax.xlane.f32.xlu2 %v1435_v63  ;;  %v1537_v35 = vsub.f32 %v3515_v38, %v1452_v52  ;;  %v1429_v63 = vmax.f32 %v3475_v41, %v3477_v49  ;;  %v1489_v38 = vmax.f32 %v3585_v17, %v3587_v21 }
 0x5fc   : > { %v1622_v62 = vmul.f32 1.442695, %v1537_v35 }
 0x5fe   : > { %2440 = vpow2.f32 %v1622_v62  ;;  %v3671_v62 = vpop.f32.mrf.mxu1 }
 0x602   : > { %1481 = vmax.xlane.f32.xlu0 %v1480_v44  ;;  %1496 = vmax.xlane.f32.xlu2 %v1495_v27  ;;  %v1464_v44 = vpop.xlane.xlu2 %1463 }
 0x603   : > { %v1544_v27 = vsub.f32 %v3541_v58, %v1464_v44  ;;  %v1545_v30 = vsub.f32 %v3543_v48, %v1464_v44  ;;  %v1461_v58 = vpop.xlane.xlu0 %1460 }
 0x605   : > { %v1636_v52 = vmul.f32 1.442695, %v1544_v27  ;;  %v1638_v16 = vmul.f32 1.442695, %v1545_v30  ;;  %v1538_v27 = vsub.f32 %v3521_v8, %v3629_v57  ;;  %v1532_v8 = vsub.f32 %v3499_v60, %v1446_v56 }
 0x606   : > { %v3689_v39 = vpop.f32.mrf.mxu1 }
 0x607   : > { %2442 = vpow2.f32 %v1636_v52  ;;  %v1483_v52 = vmax.f32 %v3577_v15, %v3579_v14 }
 0x608   : > { %2444 = vpow2.f32 %v1638_v16 }
 0x60a   : > { %1745 = vadd.xlane.f32.xlu0 %v1744_v47  ;;  %1430 = vmax.xlane.f32.xlu2 %v1429_v63  ;;  %v3661_v47 = vpop.eup %2438  ;;  %v1423_v63 = vmax.f32 %v3465_v24, %v3467_v9 }
 0x60b   : > { %v3663_v35 = vpop.eup %2440  ;;  %v3685_v16 = vpop.xlane.xlu0 %1466 }
 0x60c   : > { %v1738_v48 = vadd.f32 %v3663_v35, %v3661_v47 }
 0x60d   : > { %v3673_v30 = vpop.eup %2442 }
 0x60e   : > { %4305 = vst [vmem:[#allocation29_spill] sm:$0xff] %v3673_v30  ;;  %v3675_v44 = vpop.eup %2444 }
 0x60f   : > { %4306 = vst [vmem:[#allocation10_spill] sm:$0xff] %v3675_v44 }
 0x612   : > { %1475 = vmax.xlane.f32.xlu0 %v1474_v4  ;;  %1490 = vmax.xlane.f32.xlu2 %v1489_v38  ;;  %v1539_v4 = vsub.f32 %v3523_v45, %v3629_v57  ;;  %v1750_v38 = vadd.f32 %v3675_v44, %v3673_v30  ;;  %v1533_v45 = vsub.f32 %v3501_v59, %v1446_v56 }
 0x613   : > { %v1542_v57 = vsub.f32 %v3535_v54, %v1461_v58  ;;  %v1513_v44 = vmax.f32 %v3687_v40, %v3689_v39  ;;  %v1440_v32 = vpop.xlane.xlu0 %1439 }
 0x614   : > { %v1528_v56 = vsub.f32 %v3489_v61, %v1440_v32 }
 0x615   : > { %v1632_v30 = vmul.f32 1.442695, %v1542_v57 }
 0x61a   : > { %1739 = vadd.xlane.f32.xlu0 %v1738_v48  ;;  %1424 = vmax.xlane.f32.xlu2 %v1423_v63  ;;  %v1624_v48 = vmul.f32 1.442695, %v1538_v27  ;;  %v1626_v63 = vmul.f32 1.442695, %v1539_v4  ;;  %v1543_v27 = vsub.f32 %v3537_v18, %v1461_v58  ;;  %v1477_v4 = vmax.f32 %v3569_v28, %v3571_v25 }
 0x61b   : > { %v1529_v18 = vsub.f32 %v3491_v20, %v1440_v32 }
 0x61c   : > { %2446 = vpow2.f32 %v1624_v48  ;;  %v1634_v60 = vmul.f32 1.442695, %v1543_v27 }
 0x61d   : > { %2448 = vpow2.f32 %v1626_v63  ;;  %v1604_v63 = vmul.f32 1.442695, %v1528_v56 }
 0x622   : > { %1751 = vadd.xlane.f32.xlu0 %v1750_v38  ;;  %1484 = vmax.xlane.f32.xlu2 %v1483_v52  ;;  %v1612_v38 = vmul.f32 1.442695, %v1532_v8  ;;  %v1614_v52 = vmul.f32 1.442695, %v1533_v45  ;;  %v3699_v59 = vpop.eup %2446  ;;  %v1606_v45 = vmul.f32 1.442695, %v1529_v18 }
 0x623   : > { %v3701_v54 = vpop.eup %2448 }
 0x624   : > { %2450 = vpow2.f32 %v1612_v38  ;;  %v1741_v58 = vadd.f32 %v3701_v54, %v3699_v59  ;;  %v1534_v38 = vsub.f32 %v3507_v50, %v3603_v37 }
 0x625   : > { %2452 = vpow2.f32 %v1614_v52  ;;  %v1510_v52 = vmax.f32 %v3669_v43, %v3671_v62 }
 0x626   : > { %2454 = vpow2.f32 %v1632_v30  ;;  %v1616_v56 = vmul.f32 1.442695, %v1534_v38 }
 0x627   : > { %2456 = vpow2.f32 %v1634_v60 }
 0x628   : > { %2458 = vpow2.f32 %v1604_v63 }
 0x629   : > { %2460 = vpow2.f32 %v1606_v45 }
 0x62a   : > { %1478 = vmax.xlane.f32.xlu2 %v1477_v4  ;;  %1514 = vmax.xlane.f32.xlu0 %v1513_v44  ;;  %v1468_v44 = vmax.f32 %v3553_v23, %v3555_v5  ;;  %v3709_v48 = vpop.eup %2450  ;;  %v1535_v4 = vsub.f32 %v3509_v1, %v3603_v37  ;;  %2462 = vpow2.f32 %v1616_v56 }
 0x62b   : > { %4307 = vst [vmem:[#allocation11_spill] sm:$0xff] %v3709_v48  ;;  %v3711_v8 = vpop.eup %2452 }
 0x62c   : > { %4308 = vst [vmem:[#allocation26_spill] sm:$0xff] %v3711_v8  ;;  %v3713_v30 = vpop.eup %2454  ;;  %v1732_v32 = vadd.f32 %v3711_v8, %v3709_v48  ;;  %v1618_v18 = vmul.f32 1.442695, %v1535_v4 }
 0x62d   : > { %v3715_v61 = vpop.eup %2456 }
 0x62e   : > { %v1747_v20 = vadd.f32 %v3715_v61, %v3713_v30  ;;  %v3721_v57 = vpop.eup %2458  ;;  %2464 = vpow2.f32 %v1618_v18 }
 0x62f   : > { %4309 = vst [vmem:[#allocation27_spill] sm:$0xff] %v3721_v57  ;;  %v3723_v27 = vpop.eup %2460 }
 0x630   : > { %4310 = vst [vmem:[#allocation14_spill] sm:$0xff] %v3723_v27  ;;  %v1726_v60 = vadd.f32 %v3723_v27, %v3721_v57  ;;  %v3735_v50 = vpop.eup %2462 }
 0x631   : > { %4311 = vst [vmem:[#allocation15_spill] sm:$0xff] %v3735_v50 }
 0x632   : > { %1742 = vadd.xlane.f32.xlu2 %v1741_v58  ;;  %1469 = vmax.xlane.f32.xlu0 %v1468_v44  ;;  %v1471_v44 = vmax.f32 %v3561_v42, %v3563_v0 }
 0x634   : > { %v3737_v1 = vpop.eup %2464 }
 0x635   : > { %4312 = vst [vmem:[#allocation2_spill] sm:$0xff] %v3737_v1 }
 0x63a   : > { %1748 = vadd.xlane.f32.xlu2 %v1747_v20  ;;  %1733 = vadd.xlane.f32.xlu0 %v1732_v32  ;;  %v4313_v20 = vld [vmem:[#allocation9_spill] sm:$0xff] }
 0x642   : > { %1511 = vmax.xlane.f32.xlu2 %v1510_v52  ;;  %1727 = vadd.xlane.f32.xlu0 %v1726_v60  ;;  %v1735_v52 = vadd.f32 %v3737_v1, %v3735_v50  ;;  %v4314_v60 = vld [vmem:[#allocation31_spill] sm:$0xff] }
 0x645   : > { %v1500_v58 = vpop.xlane.xlu0 %1499 }
 0x646   : > { %v1568_v32 = vsub.f32 %v4313_v20, %v1500_v58  ;;  %v1569_v56 = vsub.f32 %v4314_v60, %v1500_v58 }
 0x648   : > { %v1684_v18 = vmul.f32 1.442695, %v1568_v32 }
 0x64a   : > { %1472 = vmax.xlane.f32.xlu2 %v1471_v44  ;;  %v1686_v44 = vmul.f32 1.442695, %v1569_v56 }
 0x64d   : > { %v1434_v37 = vpop.xlane.xlu0 %1433 }
 0x64e   : > { %v1524_v63 = vsub.f32 %v3479_v19, %v1434_v37  ;;  %v1525_v45 = vsub.f32 %v3481_v46, %v1434_v37 }
 0x650   : > { %v1596_v38 = vmul.f32 1.442695, %v1524_v63  ;;  %v1598_v4 = vmul.f32 1.442695, %v1525_v45 }
 0x652   : > { %2466 = vpow2.f32 %v1596_v38  ;;  %1736 = vadd.xlane.f32.xlu2 %v1735_v52 }
 0x653   : > { %2468 = vpow2.f32 %v1598_v4 }
 0x654   : > { %2470 = vpow2.f32 %v1684_v18 }
 0x655   : > { %v3745_v27 = vpop.xlane.xlu0 %1493  ;;  %v1506_v57 = vpop.xlane.xlu2 %1505  ;;  %2472 = vpow2.f32 %v1686_v44 }
 0x656   : > { %v1572_v46 = vsub.f32 %v3611_v29, %v1506_v57  ;;  %v1573_v63 = vsub.f32 %v3613_v34, %v1506_v57 }
 0x658   : > { %v3747_v19 = vpop.eup %2466  ;;  %v1692_v45 = vmul.f32 1.442695, %v1572_v46  ;;  %v1694_v20 = vmul.f32 1.442695, %v1573_v63 }
 0x659   : > { %4315 = vst [vmem:[#allocation3_spill] sm:$0xff] %v3747_v19  ;;  %v3750_v37 = vpop.eup %2468 }
 0x65a   : > { %4316 = vst [vmem:[#allocation24_spill] sm:$0xff] %v3750_v37  ;;  %v1720_v58 = vadd.f32 %v3750_v37, %v3747_v19  ;;  %v3757_v4 = vpop.eup %2470  ;;  %2474 = vpow2.f32 %v1692_v45 }
 0x65b   : > { %v3761_v60 = vpop.eup %2472  ;;  %2476 = vpow2.f32 %v1694_v20 }
 0x65c   : > { %1721 = vadd.xlane.f32.xlu0 %v1720_v58  ;;  %v1786_v57 = vadd.f32 %v3761_v60, %v3757_v4 }
 0x65d   : > { %v3755_v32 = vpop.xlane.xlu0 %1427  ;;  %v1443_v38 = vpop.xlane.xlu2 %1442 }
 0x65e   : > { %v1530_v52 = vsub.f32 %v3495_v22, %v1443_v38  ;;  %v1531_v29 = vsub.f32 %v3497_v51, %v1443_v38 }
 0x660   : > { %v1608_v56 = vmul.f32 1.442695, %v1530_v52  ;;  %v1610_v34 = vmul.f32 1.442695, %v1531_v29  ;;  %v3767_v46 = vpop.eup %2474 }
 0x661   : > { %4317 = vst [vmem:[#allocation25_spill] sm:$0xff] %v3767_v46  ;;  %v3769_v22 = vpop.eup %2476 }
 0x662   : > { %2478 = vpow2.f32 %v1608_v56  ;;  %4318 = vst [vmem:[#allocation6_spill] sm:$0xff] %v3769_v22  ;;  %v1792_v63 = vadd.f32 %v3769_v22, %v3767_v46  ;;  %v4322_v22 = vld [vmem:[#allocation18_spill] sm:$0xff] }
 0x663   : > { %2480 = vpow2.f32 %v1610_v34  ;;  %v1547_v46 = vsub.f32 %v4322_v22, %v3685_v16 }
 0x664   : > { %1787 = vadd.xlane.f32.xlu0 %v1786_v57  ;;  %v4321_v57 = vld [vmem:[#allocation21_spill] sm:$0xff] }
 0x665   : > { %v3765_v18 = vpop.xlane.xlu0 %1487  ;;  %v1503_v44 = vpop.xlane.xlu2 %1502  ;;  %v1546_v37 = vsub.f32 %v4321_v57, %v3685_v16 }
 0x668   : > { %v3771_v51 = vpop.eup %2478 }
 0x669   : > { %4319 = vst [vmem:[#allocation7_spill] sm:$0xff] %v3771_v51  ;;  %v3775_v58 = vpop.eup %2480 }
 0x66a   : > { %4320 = vst [vmem:[#allocation35_spill] sm:$0xff] %v3775_v58  ;;  %v1729_v45 = vadd.f32 %v3775_v58, %v3771_v51  ;;  %v1640_v58 = vmul.f32 1.442695, %v1546_v37  ;;  %v1642_v51 = vmul.f32 1.442695, %v1547_v46  ;;  %v1509_v37 = vpop.xlane.xlu1 %1508 }
 0x66c   : > { %1793 = vadd.xlane.f32.xlu0 %v1792_v63  ;;  %1730 = vadd.xlane.f32.xlu2 %v1729_v45 }
 0x66d   : > { %v3779_v20 = vpop.xlane.xlu0 %1421  ;;  %v1437_v38 = vpop.xlane.xlu2 %1436 }
 0x66e   : > { %v1526_v52 = vsub.f32 %v3485_v55, %v1437_v38  ;;  %v1527_v29 = vsub.f32 %v3487_v10, %v1437_v38  ;;  %v1570_v55 = vsub.f32 %v3605_v11, %v1503_v44  ;;  %v1571_v38 = vsub.f32 %v3607_v33, %v1503_v44 }
 0x66f   : > { %v1574_v11 = vsub.f32 %v3619_v53, %v1509_v37 }
 0x670   : > { %v1600_v56 = vmul.f32 1.442695, %v1526_v52  ;;  %v1602_v34 = vmul.f32 1.442695, %v1527_v29  ;;  %v1688_v29 = vmul.f32 1.442695, %v1570_v55 }
 0x671   : > { %v1690_v46 = vmul.f32 1.442695, %v1571_v38  ;;  %v1696_v57 = vmul.f32 1.442695, %v1574_v11 }
 0x672   : > { %2482 = vpow2.f32 %v1600_v56 }
 0x673   : > { %2484 = vpow2.f32 %v1602_v34 }
 0x674   : > { %2486 = vpow2.f32 %v1640_v58 }
 0x675   : > { %v3787_v19 = vpop.xlane.xlu0 %1481  ;;  %v1497_v63 = vpop.xlane.xlu2 %1496  ;;  %2488 = vpow2.f32 %v1642_v51  ;;  %v1575_v51 = vsub.f32 %v3621_v13, %v1509_v37 }
 0x676   : > { %2490 = vpow2.f32 %v1688_v29  ;;  %v1566_v8 = vsub.f32 %v3593_v3, %v1497_v63  ;;  %v1567_v1 = vsub.f32 %v3595_v2, %v1497_v63 }
 0x677   : > { %2492 = vpow2.f32 %v1690_v46  ;;  %v1698_v55 = vmul.f32 1.442695, %v1575_v51 }
 0x678   : > { %v3789_v45 = vpop.eup %2482  ;;  %2494 = vpow2.f32 %v1696_v57  ;;  %v1682_v50 = vmul.f32 1.442695, %v1567_v1 }
 0x679   : > { %4323 = vst [vmem:[#allocation36_spill] sm:$0xff] %v3789_v45  ;;  %v3792_v10 = vpop.eup %2484  ;;  %2496 = vpow2.f32 %v1698_v55 }
 0x67a   : > { %4324 = vst [vmem:[#allocation33_spill] sm:$0xff] %v3792_v10  ;;  %v1723_v16 = vadd.f32 %v3792_v10, %v3789_v45  ;;  %v3799_v56 = vpop.eup %2486 }
 0x67b   : > { %v3801_v58 = vpop.eup %2488 }
 0x67c   : > { %1724 = vadd.xlane.f32.xlu2 %v1723_v16  ;;  %v1753_v33 = vadd.f32 %v3801_v58, %v3799_v56  ;;  %v3811_v38 = vpop.eup %2490 }
 0x67d   : > { %v1746_v22 = vpop.xlane.xlu0 %1745  ;;  %v3797_v52 = vpop.xlane.xlu2 %1430 }
 0x67e   : > { %v3813_v16 = vpop.eup %2492  ;;  %v1523_v3 = vsub.f32 %v3477_v49, %v3797_v52 }
 0x67f   : > { %4325 = vst [vmem:[#allocation34_spill] sm:$0xff] %v3813_v16  ;;  %v1789_v53 = vadd.f32 %v3813_v16, %v3811_v38  ;;  %v3819_v37 = vpop.eup %2494 }
 0x680   : > { %4326 = vst [vmem:[#allocation4_spill] sm:$0xff] %v3819_v37  ;;  %v3821_v46 = vpop.eup %2496 }
 0x681   : > { %4327 = vst [vmem:[#allocation5_spill] sm:$0xff] %v3821_v46  ;;  %v1795_v11 = vadd.f32 %v3821_v46, %v3819_v37  ;;  %v1680_v46 = vmul.f32 1.442695, %v1566_v8 }
 0x684   : > { %1754 = vadd.xlane.f32.xlu2 %v1753_v33 }
 0x685   : > { %v3807_v44 = vpop.xlane.xlu0 %1475  ;;  %v3809_v34 = vpop.xlane.xlu2 %1490 }
 0x68c   : > { %1790 = vadd.xlane.f32.xlu2 %v1789_v53 }
 0x68d   : > { %v1740_v13 = vpop.xlane.xlu0 %1739  ;;  %v3817_v29 = vpop.xlane.xlu2 %1424 }
 0x68e   : > { %2498 = vrcp.f32 %v1740_v13 }
 0x694   : > { %1796 = vadd.xlane.f32.xlu2 %v1795_v11  ;;  %v2499_v11 = vpop.eup %2498 }
 0x695   : > { %v3825_v51 = vpop.xlane.xlu0 %1751  ;;  %v3827_v33 = vpop.xlane.xlu2 %1484  ;;  %v3846_v1 = vmul.f32 %v2499_v11, %v3661_v47  ;;  %v4339_v47 = vld [vmem:[#allocation10_spill] sm:$0xff] }
 0x69d   : > { %v3829_v57 = vpop.xlane.xlu2 %1478  ;;  %v1515_v55 = vpop.xlane.xlu0 %1514 }
 0x69e   : > { %v1578_v10 = vsub.f32 %v3687_v40, %v1515_v55  ;;  %v1579_v45 = vsub.f32 %v3689_v39, %v1515_v55  ;;  %v1522_v39 = vsub.f32 %v3475_v41, %v3797_v52 }
 0x6a0   : > { %v1704_v53 = vmul.f32 1.442695, %v1578_v10  ;;  %v1706_v48 = vmul.f32 1.442695, %v1579_v45  ;;  %v1592_v45 = vmul.f32 1.442695, %v1522_v39 }
 0x6a1   : > { %v1594_v10 = vmul.f32 1.442695, %v1523_v3 }
 0x6a2   : > { %2500 = vpow2.f32 %v1704_v53 }
 0x6a3   : > { %2502 = vpow2.f32 %v1706_v48 }
 0x6a5   : > { %v1743_v37 = vpop.xlane.xlu2 %1742 }
 0x6a6   : > { %2504 = vrcp.f32 %v1743_v37 }
 0x6a7   : > { %2506 = vpow2.f32 %v1680_v46 }
 0x6a8   : > { %v3835_v16 = vpop.eup %2500  ;;  %2508 = vpow2.f32 %v1682_v50  ;;  %v3852_v50 = vmul.f32 %v2499_v11, %v3663_v35  ;;  %v1562_v35 = vsub.f32 %v3585_v17, %v3809_v34 }
 0x6a9   : > { %v3839_v40 = vpop.eup %2502  ;;  %2510 = vrcp.f32 %v1746_v22 }
 0x6aa   : > { %v1801_v48 = vadd.f32 %v3839_v40, %v3835_v16  ;;  %v1672_v37 = vmul.f32 1.442695, %v1562_v35  ;;  %v1519_v35 = vsub.f32 %v3467_v9, %v3817_v29 }
 0x6ac   : > { %v2505_v2 = vpop.eup %2504  ;;  %1802 = vadd.xlane.f32.xlu2 %v1801_v48 }
 0x6ad   : > { %v1749_v8 = vpop.xlane.xlu2 %1748  ;;  %v3849_v63 = vmul.f32 %v2505_v2, %v3699_v59  ;;  %v3855_v41 = vmul.f32 %v2505_v2, %v3701_v54  ;;  %v3857_v49 = vpop.eup %2506  ;;  %v1563_v54 = vsub.f32 %v3587_v21, %v3809_v34 }
 0x6ae   : > { %2512 = vrcp.f32 %v1749_v8  ;;  %v3863_v59 = vpop.eup %2508 }
 0x6af   : > { %v2511_v52 = vpop.eup %2510  ;;  %2514 = vpow2.f32 %v1592_v45  ;;  %v1783_v46 = vadd.f32 %v3863_v59, %v3857_v49  ;;  %v1674_v53 = vmul.f32 1.442695, %v1563_v54 }
 0x6b0   : > { %2516 = vpow2.f32 %v1594_v10  ;;  %v3872_v55 = vmul.f32 %v2511_v52, %v3645_v12  ;;  %v3878_v17 = vmul.f32 %v2511_v52, %v3647_v7 }
 0x6b1   : > { %2518 = vpow2.f32 %v1672_v37 }
 0x6b2   : > { %2520 = vpow2.f32 %v1674_v53 }
 0x6b4   : > { %v2513_v13 = vpop.eup %2512  ;;  %1784 = vadd.xlane.f32.xlu2 %v1783_v46 }
 0x6b5   : > { %v1512_v11 = vpop.xlane.xlu2 %1511  ;;  %v3875_v39 = vmul.f32 %v2513_v13, %v3713_v30  ;;  %v3881_v21 = vmul.f32 %v2513_v13, %v3715_v61  ;;  %v3889_v48 = vpop.eup %2514  ;;  %v4328_v30 = vld [vmem:[#allocation28_spill] sm:$0xff] }
 0x6b6   : > { %v1576_v34 = vsub.f32 %v3669_v43, %v1512_v11  ;;  %v1577_v3 = vsub.f32 %v3671_v62, %v1512_v11  ;;  %v1564_v7 = vsub.f32 %v4328_v30, %v3745_v27  ;;  %v3893_v45 = vpop.eup %2516  ;;  %v4329_v43 = vld [vmem:[#allocation8_spill] sm:$0xff]  ;;  %v1518_v62 = vsub.f32 %v3465_v24, %v3817_v29  ;;  %v4330_v24 = vld [vmem:[#allocation17_spill] sm:$0xff] }
 0x6b7   : > { %v1565_v10 = vsub.f32 %v4329_v43, %v3745_v27  ;;  %v1717_v54 = vadd.f32 %v3893_v45, %v3889_v48  ;;  %v3903_v37 = vpop.eup %2518  ;;  %v1586_v27 = vmul.f32 1.442695, %v1519_v35  ;;  %v4331_v29 = vld [vmem:[#allocation20_spill] sm:$0xff]  ;;  %v1558_v30 = vsub.f32 %v3577_v15, %v3827_v33 }
 0x6b8   : > { %v1700_v8 = vmul.f32 1.442695, %v1576_v34  ;;  %v1702_v61 = vmul.f32 1.442695, %v1577_v3  ;;  %v1676_v52 = vmul.f32 1.442695, %v1564_v7  ;;  %v3905_v11 = vpop.eup %2520  ;;  %v1520_v34 = vsub.f32 %v4330_v24, %v3755_v32 }
 0x6b9   : > { %v1678_v13 = vmul.f32 1.442695, %v1565_v10  ;;  %v1584_v46 = vmul.f32 1.442695, %v1518_v62  ;;  %v1521_v3 = vsub.f32 %v4331_v29, %v3755_v32  ;;  %v1777_v43 = vadd.f32 %v3905_v11, %v3903_v37 }
 0x6ba   : > { %2522 = vpow2.f32 %v1700_v8  ;;  %v1559_v8 = vsub.f32 %v3579_v14, %v3827_v33  ;;  %v1664_v32 = vmul.f32 1.442695, %v1558_v30  ;;  %v1561_v33 = vsub.f32 %v3583_v6, %v3765_v18 }
 0x6bb   : > { %2524 = vpow2.f32 %v1702_v61  ;;  %v1588_v61 = vmul.f32 1.442695, %v1520_v34  ;;  %v1590_v10 = vmul.f32 1.442695, %v1521_v3 }
 0x6bc   : > { %1718 = vadd.xlane.f32.xlu2 %v1717_v54  ;;  %2526 = vpow2.f32 %v1676_v52  ;;  %v1666_v15 = vmul.f32 1.442695, %v1559_v8  ;;  %v1560_v54 = vsub.f32 %v3581_v31, %v3765_v18  ;;  %v1670_v34 = vmul.f32 1.442695, %v1561_v33 }
 0x6bd   : > { %2528 = vpow2.f32 %v1678_v13  ;;  %v1554_v13 = vsub.f32 %v3569_v28, %v3829_v57  ;;  %v1473_v3 = vpop.xlane.xlu2 %1472 }
 0x6be   : > { %2530 = vpow2.f32 %v1584_v46  ;;  %v1668_v24 = vmul.f32 1.442695, %v1560_v54  ;;  %v1550_v8 = vsub.f32 %v3561_v42, %v1473_v3 }
 0x6bf   : > { %2532 = vpow2.f32 %v1586_v27  ;;  %v1555_v27 = vsub.f32 %v3571_v25, %v3829_v57  ;;  %v1656_v6 = vmul.f32 1.442695, %v1554_v13  ;;  %v1516_v25 = vsub.f32 %v3459_v36, %v3779_v20  ;;  %v4332_v13 = vld [vmem:[#allocation12_spill] sm:$0xff] }
 0x6c0   : > { %v3907_v53 = vpop.eup %2522  ;;  %2534 = vpow2.f32 %v1588_v61  ;;  %v1648_v54 = vmul.f32 1.442695, %v1550_v8 }
 0x6c1   : > { %v3911_v9 = vpop.eup %2524  ;;  %2536 = vpow2.f32 %v1590_v10  ;;  %v1658_v28 = vmul.f32 1.442695, %v1555_v27  ;;  %v1580_v10 = vmul.f32 1.442695, %v1516_v25  ;;  %v4333_v27 = vld [vmem:[#allocation13_spill] sm:$0xff] }
 0x6c2   : > { %v1798_v7 = vadd.f32 %v3911_v9, %v3907_v53  ;;  %v3923_v62 = vpop.eup %2526  ;;  %2538 = vpow2.f32 %v1664_v32 }
 0x6c3   : > { %v3925_v35 = vpop.eup %2528  ;;  %2540 = vpow2.f32 %v1666_v15 }
 0x6c4   : > { %1799 = vadd.xlane.f32.xlu0 %v1798_v7  ;;  %1778 = vadd.xlane.f32.xlu2 %v1777_v43  ;;  %v3927_v52 = vpop.eup %2530  ;;  %v1780_v46 = vadd.f32 %v3925_v35, %v3923_v62  ;;  %2542 = vpow2.f32 %v1668_v24  ;;  %v1517_v7 = vsub.f32 %v3461_v26, %v3779_v20  ;;  %v1551_v43 = vsub.f32 %v3563_v0, %v1473_v3  ;;  %v1470_v20 = vpop.xlane.xlu0 %1469 }
 0x6c5   : > { %v3931_v14 = vpop.eup %2532  ;;  %2544 = vpow2.f32 %v1670_v34  ;;  %v1556_v0 = vsub.f32 %v4332_v13, %v3787_v19  ;;  %v1557_v24 = vsub.f32 %v4333_v27, %v3787_v19  ;;  %v4335_v19 = vld [vmem:[#allocation19_spill] sm:$0xff] }
 0x6c6   : > { %v1711_v31 = vadd.f32 %v3931_v14, %v3927_v52  ;;  %v3943_v29 = vpop.eup %2534  ;;  %2546 = vpow2.f32 %v1656_v6  ;;  %v1582_v32 = vmul.f32 1.442695, %v1517_v7  ;;  %v1650_v42 = vmul.f32 1.442695, %v1551_v43  ;;  %v4337_v43 = vld [vmem:[#allocation30_spill] sm:$0xff] }
 0x6c7   : > { %v3945_v18 = vpop.eup %2536  ;;  %2548 = vpow2.f32 %v1658_v28  ;;  %v1660_v34 = vmul.f32 1.442695, %v1556_v0  ;;  %v1662_v28 = vmul.f32 1.442695, %v1557_v24  ;;  %v1552_v8 = vsub.f32 %v4335_v19, %v3807_v44 }
 0x6c8   : > { %v3947_v30 = vpop.eup %2538  ;;  %v1714_v61 = vadd.f32 %v3945_v18, %v3943_v29  ;;  %2550 = vpow2.f32 %v1580_v10  ;;  %v1553_v10 = vsub.f32 %v4337_v43, %v3807_v44  ;;  %v1549_v44 = vsub.f32 %v3555_v5, %v1470_v20 }
 0x6c9   : > { %v3951_v57 = vpop.eup %2540  ;;  %2552 = vpow2.f32 %v1582_v32  ;;  %v1737_v32 = vpop.xlane.xlu2 %1736 }
 0x6ca   : > { %v1771_v36 = vadd.f32 %v3951_v57, %v3947_v30  ;;  %v3961_v15 = vpop.eup %2542  ;;  %2554 = vpow2.f32 %v1648_v54  ;;  %v1654_v0 = vmul.f32 1.442695, %v1553_v10 }
 0x6cb   : > { %v3963_v26 = vpop.eup %2544  ;;  %2556 = vpow2.f32 %v1650_v42  ;;  %v1652_v42 = vmul.f32 1.442695, %v1552_v8  ;;  %v1646_v8 = vmul.f32 1.442695, %v1549_v44 }
 0x6cc   : > { %1781 = vadd.xlane.f32.xlu0 %v1780_v46  ;;  %1712 = vadd.xlane.f32.xlu2 %v1711_v31  ;;  %v3965_v33 = vpop.eup %2546  ;;  %v1774_v31 = vadd.f32 %v3963_v26, %v3961_v15  ;;  %2558 = vpow2.f32 %v1660_v34 }
 0x6cd   : > { %v3969_v46 = vpop.eup %2548  ;;  %2560 = vpow2.f32 %v1662_v28 }
 0x6ce   : > { %v1765_v6 = vadd.f32 %v3969_v46, %v3965_v33  ;;  %v3977_v3 = vpop.eup %2550  ;;  %2562 = vpow2.f32 %v1652_v42 }
 0x6cf   : > { %v3979_v25 = vpop.eup %2552  ;;  %2564 = vpow2.f32 %v1654_v0 }
 0x6d0   : > { %v3981_v7 = vpop.eup %2554  ;;  %v1708_v54 = vadd.f32 %v3979_v25, %v3977_v3 }
 0x6d1   : > { %4334 = vst [vmem:[#allocation9_spill] sm:$0xff] %v3981_v7 }
 0x6d4   : > { %1715 = vadd.xlane.f32.xlu0 %v1714_v61  ;;  %1772 = vadd.xlane.f32.xlu2 %v1771_v36  ;;  %v3985_v61 = vpop.eup %2556  ;;  %v1734_v36 = vpop.xlane.xlu0 %1733 }
 0x6d5   : > { %4336 = vst [vmem:[#allocation31_spill] sm:$0xff] %v3985_v61  ;;  %v1759_v13 = vadd.f32 %v3985_v61, %v3981_v7  ;;  %v3993_v27 = vpop.eup %2558 }
 0x6d6   : > { %v3995_v24 = vpop.eup %2560 }
 0x6d7   : > { %v4001_v43 = vpop.eup %2562 }
 0x6d8   : > { %v4003_v10 = vpop.eup %2564 }
 0x6dc   : > { %1775 = vadd.xlane.f32.xlu0 %v1774_v31  ;;  %1766 = vadd.xlane.f32.xlu2 %v1765_v6  ;;  %v1548_v31 = vsub.f32 %v3553_v23, %v1470_v20  ;;  %v1768_v6 = vadd.f32 %v3995_v24, %v3993_v27  ;;  %v1728_v28 = vpop.xlane.xlu0 %1727  ;;  %v1762_v23 = vadd.f32 %v4003_v10, %v4001_v43 }
 0x6de   : > { %v1644_v19 = vmul.f32 1.442695, %v1548_v31 }
 0x6df   : > { %v1731_v34 = vpop.xlane.xlu2 %1730 }
 0x6e0   : > { %2566 = vpow2.f32 %v1644_v19  ;;  %v4338_v19 = vld [vmem:[#allocation29_spill] sm:$0xff] }
 0x6e1   : > { %2568 = vpow2.f32 %v1646_v8 }
 0x6e2   : > { %2570 = vrcp.f32 %v3825_v51 }
 0x6e4   : > { %1709 = vadd.xlane.f32.xlu0 %v1708_v54  ;;  %1760 = vadd.xlane.f32.xlu2 %v1759_v13  ;;  %v1722_v42 = vpop.xlane.xlu0 %1721 }
 0x6e6   : > { %v4007_v5 = vpop.eup %2566 }
 0x6e7   : > { %v4009_v20 = vpop.eup %2568 }
 0x6e8   : > { %v1756_v0 = vadd.f32 %v4009_v20, %v4007_v5  ;;  %v2571_v44 = vpop.eup %2570 }
 0x6e9   : > { %v1864_v8 = vmul.f32 %v2571_v44, %v4338_v19 }
 0x6ec   : > { %1769 = vadd.xlane.f32.xlu0 %v1768_v6  ;;  %v1788_v31 = vpop.xlane.xlu0 %1787 }
 0x6ef   : > { %v1725_v54 = vpop.xlane.xlu2 %1724 }
 0x6f4   : > { %1763 = vadd.xlane.f32.xlu0 %v1762_v23  ;;  %v1865_v23 = vmul.f32 %v2571_v44, %v4339_v47 }
 0x6f7   : > { %v1755_v13 = vpop.xlane.xlu2 %1754 }
 0x6f8   : > { %2572 = vrcp.f32 %v1755_v13 }
 0x6f9   : > { %2574 = vrcp.f32 %v1788_v31 }
 0x6fc   : > { %1757 = vadd.xlane.f32.xlu0 %v1756_v0 }
 0x6fe   : > { %v2573_v6 = vpop.eup %2572 }
 0x6ff   : > { %v1866_v22 = vmul.f32 %v2573_v6, %v3799_v56  ;;  %v1867_v2 = vmul.f32 %v2573_v6, %v3801_v58  ;;  %v1791_v12 = vpop.xlane.xlu2 %1790  ;;  %v2575_v61 = vpop.eup %2574  ;;  %v4340_v56 = vld [vmem:[#allocation34_spill] sm:$0xff]  ;;  %v4345_v6 = vld [vmem:[#allocation15_spill] sm:$0xff] }
 0x700   : > { %2576 = vrcp.f32 %v1791_v12  ;;  %v4019_v7 = vmul.f32 %v2575_v61, %v3757_v4  ;;  %v4025_v47 = vmul.f32 %v2575_v61, %v3761_v60  ;;  %v4341_v12 = vpack.c.bf16 %v3875_v39, %v3872_v55  ;;  %v4346_v39 = vld [vmem:[#allocation2_spill] sm:$0xff] }
 0x701   : > { %v1914_v51 = vpack.c.bf16 %v1866_v22, %v1864_v8  ;;  %v1915_v13 = vpack.c.bf16 %v1867_v2, %v1865_v23  ;;  %v4342_v4 = vpack.c.bf16 %v3881_v21, %v3878_v17  ;;  %2578 = vrcp.f32 %v1737_v32  ;;  %v4347_v17 = vld [vmem:[#allocation11_spill] sm:$0xff]  ;;  %v4348_v32 = vld [vmem:[#allocation26_spill] sm:$0xff] }
 0x702   : > { %2580 = vrcp.f32 %v1734_v36  ;;  %v4344_v2 = vpack.c.bf16 %v3855_v41, %v3852_v50  ;;  %v4350_v41 = vld [vmem:[#allocation35_spill] sm:$0xff] }
 0x703   : > { %1936 = vmatpush.bf16.xpose.msra.mxu2 %v1914_v51  ;;  %1949 = vmatpush.bf16.xpose.msra.mxu3 %v1915_v13  ;;  %2582 = vrcp.f32 %v1731_v34  ;;  %v4351_v13 = vld [vmem:[#allocation27_spill] sm:$0xff] }
 0x704   : > { %2584 = vrcp.f32 %v1728_v28 }
 0x705   : > { %2586 = vrcp.f32 %v1725_v54 }
 0x706   : > { %v2577_v0 = vpop.eup %2576  ;;  %2588 = vrcp.f32 %v1722_v42 }
 0x707   : > { %v4022_v31 = vmul.f32 %v2577_v0, %v3811_v38  ;;  %v4028_v44 = vmul.f32 %v2577_v0, %v4340_v56  ;;  %v2579_v60 = vpop.eup %2578  ;;  %v4343_v38 = vpack.c.bf16 %v3849_v63, %v3846_v1  ;;  %v4349_v63 = vld [vmem:[#allocation7_spill] sm:$0xff]  ;;  %v4352_v56 = vld [vmem:[#allocation14_spill] sm:$0xff] }
 0x708   : > { %v2581_v61 = vpop.eup %2580  ;;  %v1854_v55 = vmul.f32 %v2579_v60, %v4345_v6  ;;  %v1855_v19 = vmul.f32 %v2579_v60, %v4346_v39  ;;  %v4355_v39 = vld [vmem:[#allocation3_spill] sm:$0xff] }
 0x709   : > { %v1926_v58 = vpack.c.bf16 %v4022_v31, %v4019_v7  ;;  %v1927_v22 = vpack.c.bf16 %v4028_v44, %v4025_v47  ;;  %v1852_v21 = vmul.f32 %v2581_v61, %v4347_v17  ;;  %v1853_v36 = vmul.f32 %v2581_v61, %v4348_v32  ;;  %v2583_v51 = vpop.eup %2582  ;;  %v4353_v61 = vld [vmem:[#allocation36_spill] sm:$0xff] }
 0x70a   : > { %v2585_v1 = vpop.eup %2584  ;;  %v1850_v50 = vmul.f32 %v2583_v51, %v4349_v63  ;;  %v1851_v34 = vmul.f32 %v2583_v51, %v4350_v41  ;;  %v4356_v17 = vld [vmem:[#allocation24_spill] sm:$0xff] }
 0x70b   : > { %1937 = vmatpush.bf16.xpose.msra.mxu2 %v4341_v12  ;;  %1950 = vmatpush.bf16.xpose.msra.mxu3 %v4342_v4  ;;  %v1908_v8 = vpack.c.bf16 %v1854_v55, %v1852_v21  ;;  %v1909_v23 = vpack.c.bf16 %v1855_v19, %v1853_v36  ;;  %v1848_v0 = vmul.f32 %v2585_v1, %v4351_v13  ;;  %v1797_v12 = vpop.xlane.xlu2 %1796  ;;  %v4354_v55 = vld [vmem:[#allocation33_spill] sm:$0xff] }
 0x70c   : > { %v1849_v28 = vmul.f32 %v2585_v1, %v4352_v56 }
 0x70d   : > { %v1906_v4 = vpack.c.bf16 %v1850_v50, %v1848_v0 }
 0x70e   : > { %v1907_v60 = vpack.c.bf16 %v1851_v34, %v1849_v28 }
 0x713   : > { %1938 = vmatpush.bf16.xpose.msra.mxu2 %v4343_v38  ;;  %1951 = vmatpush.bf16.xpose.msra.mxu3 %v4344_v2  ;;  %v2587_v38 = vpop.eup %2586 }
 0x714   : > { %v2589_v2 = vpop.eup %2588  ;;  %v1846_v6 = vmul.f32 %v2587_v38, %v4353_v61  ;;  %v1847_v54 = vmul.f32 %v2587_v38, %v4354_v55 }
 0x715   : > { %v1844_v19 = vmul.f32 %v2589_v2, %v4355_v39  ;;  %v1845_v21 = vmul.f32 %v2589_v2, %v4356_v17 }
 0x717   : > { %v1904_v32 = vpack.c.bf16 %v1846_v6, %v1844_v19  ;;  %v1905_v36 = vpack.c.bf16 %v1847_v54, %v1845_v21 }
 0x71b   : > { %1939 = vmatpush.bf16.xpose.msra.mxu2 %v1908_v8  ;;  %1952 = vmatpush.bf16.xpose.msra.mxu3 %v1909_v23  ;;  %v1794_v8 = vpop.xlane.xlu0 %1793 }
 0x71f   : > { %v1803_v42 = vpop.xlane.xlu2 %1802 }
 0x723   : > { %1940 = vmatpush.bf16.xpose.msra.mxu2 %v1906_v4  ;;  %1953 = vmatpush.bf16.xpose.msra.mxu3 %v1907_v60 }
 0x727   : > { %v1785_v23 = vpop.xlane.xlu2 %1784 }
 0x72b   : > { %1941 = vmatpush.bf16.xpose.msra.mxu2 %v1904_v32  ;;  %1954 = vmatpush.bf16.xpose.msra.mxu3 %v1905_v36 }
 0x72f   : > { %v1719_v1 = vpop.xlane.xlu2 %1718 }
 0x730   : > { %2590 = vrcp.f32 %v1719_v1 }
 0x736   : > { %v2591_v34 = vpop.eup %2590 }
 0x737   : > { %v1800_v51 = vpop.xlane.xlu0 %1799  ;;  %v4058_v41 = vpop.xlane.xlu2 %1778  ;;  %v1842_v28 = vmul.f32 %v2591_v34, %v3889_v48  ;;  %v1843_v60 = vmul.f32 %v2591_v34, %v3893_v45  ;;  %v4360_v34 = vld [vmem:[#allocation23_spill] sm:$0xff] }
 0x73f   : > { %v1782_v63 = vpop.xlane.xlu0 %1781  ;;  %v1713_v61 = vpop.xlane.xlu2 %1712 }
 0x747   : > { %v1716_v50 = vpop.xlane.xlu0 %1715 }
 0x748   : > { %2592 = vrcp.f32 %v1716_v50  ;;  %v4359_v50 = vld [vmem:[#allocation22_spill] sm:$0xff] }
 0x749   : > { %2594 = vrcp.f32 %v1800_v51 }
 0x74a   : > { %2596 = vrcp.f32 %v1713_v61 }
 0x74b   : > { %2598 = vrcp.f32 %v1803_v42 }
 0x74e   : > { %v2593_v13 = vpop.eup %2592 }
 0x74f   : > { %v1776_v0 = vpop.xlane.xlu0 %1775  ;;  %v1840_v56 = vmul.f32 %v2593_v13, %v3943_v29  ;;  %v1841_v4 = vmul.f32 %v2593_v13, %v3945_v18  ;;  %v2595_v55 = vpop.eup %2594  ;;  %v4361_v13 = vld [vmem:[#allocation25_spill] sm:$0xff] }
 0x750   : > { %v2597_v54 = vpop.eup %2596  ;;  %v1896_v48 = vmul.f32 %v2595_v55, %v3907_v53  ;;  %v1897_v45 = vmul.f32 %v2595_v55, %v3911_v9  ;;  %v4357_v9 = vld [vmem:[#allocation4_spill] sm:$0xff] }
 0x751   : > { %v1902_v38 = vpack.c.bf16 %v1842_v28, %v1840_v56  ;;  %v1903_v2 = vpack.c.bf16 %v1843_v60, %v1841_v4  ;;  %v2599_v39 = vpop.eup %2598  ;;  %v1838_v19 = vmul.f32 %v2597_v54, %v3927_v52  ;;  %v1839_v21 = vmul.f32 %v2597_v54, %v3931_v14  ;;  %v4362_v56 = vld [vmem:[#allocation6_spill] sm:$0xff] }
 0x752   : > { %v1898_v42 = vmul.f32 %v2599_v39, %v3835_v16  ;;  %v1899_v32 = vmul.f32 %v2599_v39, %v3839_v40  ;;  %v1932_v14 = vrot.slane %v4359_v50, 1  ;;  %v1933_v16 = vrot.slane %v4360_v34, 1  ;;  %v1996_v50 = vld [vmem:[%s4143_s3] sm:$0x3] }
 0x753   : > { %1942 = vmatpush.bf16.xpose.msra.mxu2 %v1902_v38  ;;  %1955 = vmatpush.bf16.xpose.msra.mxu3 %v1903_v2 }
 0x754   : > { %v1930_v51 = vpack.c.bf16 %v1898_v42, %v1896_v48 }
 0x757   : > { %v1710_v6 = vpop.xlane.xlu0 %1709 }
 0x758   : > { %2600 = vrcp.f32 %v1710_v6 }
 0x759   : > { %2602 = vrcp.f32 %v1797_v12 }
 0x75a   : > { %2604 = vrcp.f32 %v1794_v8  ;;  %v1931_v8 = vpack.c.bf16 %v1899_v32, %v1897_v45 }
 0x75b   : > { %2606 = vrcp.f32 %v1782_v63  ;;  %v1773_v63 = vpop.xlane.xlu2 %1772 }
 0x75c   : > { %2608 = vrcp.f32 %v1785_v23 }
 0x75d   : > { %2610 = vrcp.f32 %v1776_v0 }
 0x75e   : > { %v2601_v29 = vpop.eup %2600  ;;  %2612 = vrcp.f32 %v4058_v41 }
 0x75f   : > { %v1836_v18 = vmul.f32 %v2601_v29, %v3977_v3  ;;  %v1837_v17 = vmul.f32 %v2601_v29, %v3979_v25  ;;  %v2603_v1 = vpop.eup %2602  ;;  %v4358_v3 = vld [vmem:[#allocation5_spill] sm:$0xff]  ;;  %v1770_v61 = vpop.xlane.xlu0 %1769 }
 0x760   : > { %v2605_v53 = vpop.eup %2604  ;;  %v1894_v52 = vmul.f32 %v2603_v1, %v4357_v9  ;;  %v1895_v25 = vmul.f32 %v2603_v1, %v4358_v3  ;;  %2614 = vrcp.f32 %v1770_v61  ;;  %v4363_v1 = vld [vmem:[#allocation9_spill] sm:$0xff] }
 0x761   : > { %v1900_v36 = vpack.c.bf16 %v1838_v19, %v1836_v18  ;;  %v1901_v12 = vpack.c.bf16 %v1839_v21, %v1837_v17  ;;  %v1892_v40 = vmul.f32 %v2605_v53, %v4361_v13  ;;  %v1893_v28 = vmul.f32 %v2605_v53, %v4362_v56  ;;  %v2607_v38 = vpop.eup %2606 }
 0x762   : > { %v2609_v2 = vpop.eup %2608  ;;  %v1884_v6 = vmul.f32 %v2607_v38, %v3923_v62  ;;  %v1885_v55 = vmul.f32 %v2607_v38, %v3925_v35  ;;  %2616 = vrcp.f32 %v1773_v63  ;;  %v4366_v38 = vld [vmem:[#allocation16_spill] sm:$0xff] }
 0x763   : > { %1943 = vmatpush.bf16.xpose.msra.mxu2 %v1900_v36  ;;  %1956 = vmatpush.bf16.xpose.msra.mxu3 %v1901_v12  ;;  %v1928_v4 = vpack.c.bf16 %v1894_v52, %v1892_v40  ;;  %v1929_v60 = vpack.c.bf16 %v1895_v25, %v1893_v28  ;;  %v1886_v23 = vmul.f32 %v2609_v2, %v3857_v49  ;;  %v1767_v49 = vpop.xlane.xlu2 %1766  ;;  %v4365_v25 = vld [vmem:[#allocation32_spill] sm:$0xff] }
 0x764   : > { %v1887_v54 = vmul.f32 %v2609_v2, %v3863_v59 }
 0x765   : > { %v1924_v7 = vpack.c.bf16 %v1886_v23, %v1884_v6 }
 0x766   : > { %v1925_v31 = vpack.c.bf16 %v1887_v54, %v1885_v55 }
 0x767   : > { %v1764_v35 = vpop.xlane.xlu0 %1763 }
 0x768   : > { %2618 = vrcp.f32 %v1764_v35 }
 0x769   : > { %2620 = vrcp.f32 %v1767_v49 }
 0x76a   : > { %1944 = vmatmul.bf16.vlgmr.msra.gmra.mxu2 %v1932_v14  ;;  %1957 = vmatmul.bf16.vlgmr.msra.gmra.mxu3 %v1933_v16 }
 0x76b   : > { %1962 = vmatpush.bf16.xpose.msrb.mxu2 %v1930_v51  ;;  %1975 = vmatpush.bf16.xpose.msrb.mxu3 %v1931_v8  ;;  %v1761_v17 = vpop.xlane.xlu2 %1760 }
 0x773   : > { %1963 = vmatpush.bf16.xpose.msrb.mxu2 %v1928_v4  ;;  %1976 = vmatpush.bf16.xpose.msrb.mxu3 %v1929_v60 }
 0x77b   : > { %1964 = vmatpush.bf16.xpose.msrb.mxu2 %v1926_v58  ;;  %1977 = vmatpush.bf16.xpose.msrb.mxu3 %v1927_v22  ;;  %v2611_v58 = vpop.eup %2610 }
 0x77c   : > { %v2613_v47 = vpop.eup %2612  ;;  %v1880_v44 = vmul.f32 %v2611_v58, %v3961_v15  ;;  %v1881_v62 = vmul.f32 %v2611_v58, %v3963_v26 }
 0x77d   : > { %v1882_v22 = vmul.f32 %v2613_v47, %v3903_v37  ;;  %v1883_v41 = vmul.f32 %v2613_v47, %v3905_v11  ;;  %v2615_v39 = vpop.eup %2614  ;;  %v1758_v37 = vpop.xlane.xlu0 %1757 }
 0x77e   : > { %v2617_v29 = vpop.eup %2616  ;;  %v1876_v48 = vmul.f32 %v2615_v39, %v3993_v27  ;;  %v1877_v15 = vmul.f32 %v2615_v39, %v3995_v24  ;;  %2622 = vrcp.f32 %v1758_v37 }
 0x77f   : > { %v1922_v0 = vpack.c.bf16 %v1882_v22, %v1880_v44  ;;  %v1923_v59 = vpack.c.bf16 %v1883_v41, %v1881_v62  ;;  %v1878_v26 = vmul.f32 %v2617_v29, %v3947_v30  ;;  %v1879_v45 = vmul.f32 %v2617_v29, %v3951_v57  ;;  %v2619_v19 = vpop.eup %2618 }
 0x780   : > { %v2621_v21 = vpop.eup %2620  ;;  %v1872_v42 = vmul.f32 %v2619_v19, %v4001_v43  ;;  %v1873_v27 = vmul.f32 %v2619_v19, %v4003_v10  ;;  %2624 = vrcp.f32 %v1761_v17  ;;  %v4364_v43 = vld [vmem:[#allocation31_spill] sm:$0xff] }
 0x781   : > { %v1920_v18 = vpack.c.bf16 %v1878_v26, %v1876_v48  ;;  %v1921_v11 = vpack.c.bf16 %v1879_v45, %v1877_v15  ;;  %v1874_v24 = vmul.f32 %v2621_v21, %v3965_v33  ;;  %v1875_v30 = vmul.f32 %v2621_v21, %v3969_v46 }
 0x783   : > { %1965 = vmatpush.bf16.xpose.msrb.mxu2 %v1924_v7  ;;  %1978 = vmatpush.bf16.xpose.msrb.mxu3 %v1925_v31  ;;  %v1918_v32 = vpack.c.bf16 %v1874_v24, %v1872_v42  ;;  %v1919_v57 = vpack.c.bf16 %v1875_v30, %v1873_v27 }
 0x784   : > { %v2623_v36 = vpop.eup %2622 }
 0x785   : > { %v1868_v51 = vmul.f32 %v2623_v36, %v4007_v5  ;;  %v1869_v8 = vmul.f32 %v2623_v36, %v4009_v20 }
 0x786   : > { %v2625_v12 = vpop.eup %2624 }
 0x787   : > { %v1870_v53 = vmul.f32 %v2625_v12, %v4363_v1  ;;  %v1871_v9 = vmul.f32 %v2625_v12, %v4364_v43 }
 0x789   : > { %v1916_v10 = vpack.c.bf16 %v1870_v53, %v1868_v51  ;;  %v1917_v52 = vpack.c.bf16 %v1871_v9, %v1869_v8 }
 0x78b   : > { %1966 = vmatpush.bf16.xpose.msrb.mxu2 %v1922_v0  ;;  %1979 = vmatpush.bf16.xpose.msrb.mxu3 %v1923_v59 }
 0x793   : > { %1967 = vmatpush.bf16.xpose.msrb.mxu2 %v1920_v18  ;;  %1980 = vmatpush.bf16.xpose.msrb.mxu3 %v1921_v11 }
 0x79b   : > { %1968 = vmatpush.bf16.xpose.msrb.mxu2 %v1918_v32  ;;  %1981 = vmatpush.bf16.xpose.msrb.mxu3 %v1919_v57 }
 0x7a3   : > { %1969 = vmatpush.bf16.xpose.msrb.mxu2 %v1916_v10  ;;  %1982 = vmatpush.bf16.xpose.msrb.mxu3 %v1917_v52 }
 0x7aa   : > { %1970 = vmatmul.bf16.vlgmr.msrb.gmra.mxu2 %v1932_v14  ;;  %1983 = vmatmul.bf16.vlgmr.msrb.gmra.mxu3 %v1933_v16  ;;  %v1999_v14 = vld [vmem:[%s4144_s4] sm:$0xf] }
 0x7ab   : > { %2002 = vperm.xlu1 %2241, %v1999_v14  }
 0x7ed   : > { %v1945_v33 = vpop.f32.mrf.mxu2  ;;  %v1958_v46 = vpop.f32.mrf.mxu3 }
 0x7ee   : > { %v1959_v3 = vadd.f32 %v1958_v46, %v1945_v33 }
 0x7f0   : > { %v1990_v5 = vrot.slane %v1959_v3, 6 }
 0x7f2   : > { %v1994_v20 = vsel %vm277_vm0, %v4365_v25, %v1990_v5 }
 0x7f3   : > { %v1997_v13 = vpack.c.bf16 %v1994_v20, %v1994_v20 }
 0x7f5   : > { %v1947_v40 = vpop.f32.mrf.mxu2  ;;  %v1960_v56 = vpop.f32.mrf.mxu3  ;;  %v2009_v28 = vsel %vm277_vm0, %v1997_v13, 0 }
 0x7f6   : > { %2021 = vmatpush.bf16.msra.mxu2 %v2009_v28 }
 0x7f9   : > { %2207 = vmatmul.msk.bf16.vlgmr.msra.gmra.mxu2 %vm273_vm1, %v1996_v50 }
 0x81d   : > { %v2003_v7 = vpop.permute.xlu1 %2002 }
 0x82d   : > { %v1971_v34 = vpop.f32.mrf.mxu2  ;;  %v1984_v16 = vpop.f32.mrf.mxu3 }
 0x82e   : > { %v1985_v4 = vadd.f32 %v1984_v16, %v1971_v34 }
 0x830   : > { %v1991_v60 = vrot.slane %v1985_v4, 6 }
 0x832   : > { %v1995_v2 = vsel %vm277_vm0, %v4366_v38, %v1991_v60 }
 0x833   : > { %v1998_v61 = vpack.c.bf16 %v1995_v2, %v1995_v2 }
 0x835   : > { %v1973_v6 = vpop.f32.mrf.mxu2  ;;  %v1986_v55 = vpop.f32.mrf.mxu3  ;;  %v2012_v63 = vsel %vm277_vm0, %v1998_v61, 0 }
 0x836   : > { %2034 = vmatpush.bf16.msra.mxu3 %v2012_v63 }
 0x839   : > { %2208 = vmatmul.msk.bf16.vlgmr.msra.gmra.mxu3 %vm273_vm1, %v1996_v50 }
 0x87c   : > { %v2023_v23 = vpop.f32.mrf.mxu2 }
 0x87d   : > { %v2024_v47 = vadd.f32 %v2023_v23, %v2003_v7 }
 0x884   : > { %v2025_v54 = vpop.f32.mrf.mxu2 }
 0x8bc   : > { %v2036_v31 = vpop.f32.mrf.mxu3 }
 0x8bd   : > { %v2037_v58 = vadd.f32 %v2036_v31, %v2003_v7 }
 0x8bf   : > { %v2042_v44 = vrot.slane %v2037_v58, 4 }
 0x8c1   : > { %v2044_v62 = vsel %vm2043_vm4, %v2024_v47, %v2042_v44 }
 0x8c2   : > { %2046 = vst [vmem:[%s246_s16] sm:$0xff] %v2044_v62 }
 0x8c4   : > { %v2038_v35 = vpop.f32.mrf.mxu3 }
 0x8c5 PF: > { %s15_s20 = sadd.s32 1, %s2648_s20   ;;  %s4367_s18 = smov %s2644_s19 }
 0x8c6   : > { %p12_p5 = scmp.ge.s32.totalorder %s15_s20, 4   ;;  %s4368_s19 = smov %s4370_s21 }
 0x8c8   :  { %14 = sbr.rel (!%p12_p5) target bundleno = 2 (0x2), region = 70 }

</bundles_post_ra>
